<compile_context>
chip_gen: v5e
topology: v5e:2x2
jax: 0.10.0
libtpu: 0.0.40
codegen_flags: <defaults>
</compile_context>

<pallas_src>
from functools import partial

import jax
import jax.numpy as jnp
from jax.experimental import pallas as pl
from jax.experimental.pallas import tpu as pltpu

BN_EPS = 1e-5


# ----------------------------- in-kernel helpers -----------------------------

def _zero_border(pad_ref):
    """Zero only the 1-element halo border of the padded-activation scratch."""
    hpad, wpad, c = pad_ref.shape
    dt = pad_ref.dtype
    pad_ref[0:1, :, :] = jnp.zeros((1, wpad, c), dt)             # top row
    pad_ref[hpad - 1:hpad, :, :] = jnp.zeros((1, wpad, c), dt)   # bottom row
    pad_ref[:, 0:1, :] = jnp.zeros((hpad, 1, c), dt)             # left column
    pad_ref[:, wpad - 1:wpad, :] = jnp.zeros((hpad, 1, c), dt)   # right column


def _fill_patch(patch_ref, pad_ref, hp, wp, c):
    """im2col: 9 shifted channel-slice stores into the (Hp*Wp, 9*C) scratch.

    Tap order (dy, dx, ci) matches w_hwio.reshape(9*C, Cout).
    """
    p = hp * wp
    t = 0
    for dy in range(3):
        for dx in range(3):
            tap = pad_ref[dy:dy + hp, dx:dx + wp, :]             # (Hp, Wp, C)
            patch_ref[:, t * c:(t + 1) * c] = tap.reshape(p, c)
            t += 1


def _partial_bn_stats(stats_ref, y):
    """Per-image BatchNorm partials: row 0 = sum, row 1 = sum of squares (f32)."""
    stats_ref[:, 0:1, :] = jnp.sum(y, axis=0, keepdims=True).reshape(1, 1, -1)
    stats_ref[:, 1:2, :] = jnp.sum(y * y, axis=0, keepdims=True).reshape(1, 1, -1)


# ----------------------------- Pallas kernels --------------------------------

def _pool_conv1_kernel(x_ref, w_ref, y1_ref, stats_ref, pad_ref, patch_ref):
    _, hp, _, wp, c2 = x_ref.shape
    cin = c2 // 2

    # ---- MaxPool2d(2): input block is the (1, Hp, 2, Wp, 2*Cin) phase view ----
    x = x_ref[...]
    xh = jnp.maximum(x[:, :, 0], x[:, :, 1])                    # pool H phase
    pooled = jnp.maximum(xh[..., :cin], xh[..., cin:])          # pool W phase

    # ---- conv1: border-only zero, direct im2col assembly, one MXU matmul ----
    _zero_border(pad_ref)
    pad_ref[1:hp + 1, 1:wp + 1, :] = pooled.reshape(hp, wp, cin).astype(pad_ref.dtype)
    _fill_patch(patch_ref, pad_ref, hp, wp, cin)
    y1 = jnp.dot(patch_ref[...], w_ref[...],
                 preferred_element_type=jnp.float32)             # (Hp*Wp, Cmid) f32

    y1_ref[...] = y1.reshape(1, hp, wp, -1).astype(y1_ref.dtype)
    _partial_bn_stats(stats_ref, y1)


def _bn1_conv2_kernel(y1_ref, w_ref, scale_ref, shift_ref,
                      y2_ref, stats_ref, pad_ref, patch_ref):
    _, hp, wp, cmid = y1_ref.shape

    # ---- BN1 (precomputed global scale/shift) + ReLU, element-wise in f32 ----
    y1 = y1_ref[...].astype(jnp.float32).reshape(hp * wp, cmid)
    a1 = jnp.maximum(y1 * scale_ref[...] + shift_ref[...], 0.0)

    # ---- conv2 ----
    _zero_border(pad_ref)
    pad_ref[1:hp + 1, 1:wp + 1, :] = a1.reshape(hp, wp, cmid).astype(pad_ref.dtype)
    _fill_patch(patch_ref, pad_ref, hp, wp, cmid)
    y2 = jnp.dot(patch_ref[...], w_ref[...],
                 preferred_element_type=jnp.float32)             # (Hp*Wp, Cout) f32

    # TODO(synk): for Cout < 128 a lane-dense (Hp, Wp*Cout) output slab would
    # avoid masked vst writeback; moot for deeper Down blocks with Cout >= 128.
    y2_ref[...] = y2.reshape(1, hp, wp, -1).astype(y2_ref.dtype)
    _partial_bn_stats(stats_ref, y2)


# ----------------------------- wrapper ----------------------------------------

def _nbytes(shape, dtype):
    n = 1
    for d in shape:
        n *= int(d)
    return n * jnp.dtype(dtype).itemsize


def _vmem_limit(*byte_counts):
    est = sum(byte_counts) + (4 << 20)                 # headroom for compiler temps
    return int(min(max(est, 8 << 20), 48 << 20))       # stay under v7x's 64 MiB/TC


@partial(jax.jit, static_argnames=("compute_dtype",))
def down_forward(x_nchw, params, *, compute_dtype=jnp.bfloat16):
    """x_nchw: (N, Cin, H, W) f32 (PyTorch layout) -> (N, Cout, H//2, W//2) f32."""
    w1, g1, b1, w2, g2, b2 = params                    # conv weights in HWIO (3,3,Ci,Co)
    N, Cin, H, W = x_nchw.shape
    Hp, Wp = H // 2, W // 2
    Cmid, Cout = w1.shape[-1], w2.shape[-1]
    P = N * Hp * Wp                                    # BatchNorm population size

    # MaxPool2d(2) floors odd spatial dims, exactly like PyTorch.
    x_nchw = x_nchw[:, :, :2 * Hp, :2 * Wp]

    # Single layout pass NCHW -> NHWC, reshaped into the 2x2-pool phase view and
    # cast to the MXU compute dtype (halves HBM->VMEM DMA when bf16).
    # TODO(synk): keep the surrounding model NHWC end-to-end to drop this pass.
    x5 = jnp.transpose(x_nchw, (0, 2, 3, 1)).reshape(N, Hp, 2, Wp, 2 * Cin)
    x5 = x5.astype(compute_dtype)

    # im2col weights (9*Ci, Co), tap order (dy, dx, ci) matches _fill_patch.
    w1m = w1.reshape(9 * Cin, Cmid).astype(compute_dtype)
    w2m = w2.reshape(9 * Cmid, Cout).astype(compute_dtype)

    def _bn_affine(stats, gamma, beta):
        # Global (batch) statistics from the per-image partial sums; clamp the
        # E[x^2] - mean^2 form to avoid negative variance / NaN rsqrt.
        s = jnp.sum(stats.astype(jnp.float32), axis=0)           # (2, C)
        mean = s[0] / float(P)
        var = jnp.maximum(s[1] / float(P) - mean * mean, 0.0)
        scale = gamma.reshape(-1).astype(jnp.float32) * jax.lax.rsqrt(var + BN_EPS)
        shift = beta.reshape(-1).astype(jnp.float32) - mean * scale
        return scale.reshape(1, -1), shift.reshape(1, -1)

    # ---------------- pass 1: max-pool + conv1 (+ BN1 partial stats) ----------
    vmem1 = _vmem_limit(
        2 * _nbytes((1, Hp, 2, Wp, 2 * Cin), compute_dtype),
        2 * _nbytes((1, Hp, Wp, Cmid), compute_dtype),
        2 * _nbytes((1, 2, Cmid), jnp.float32),
        _nbytes((9 * Cin, Cmid), compute_dtype),
        _nbytes((Hp + 2, Wp + 2, Cin), compute_dtype),
        _nbytes((Hp * Wp, 9 * Cin), compute_dtype),
        _nbytes((Hp * Wp, Cmid), jnp.float32),
    )
    y1_raw, stats1 = pl.pallas_call(
        _pool_conv1_kernel,
        grid=(N,),
        in_specs=[
            pl.BlockSpec((1, Hp, 2, Wp, 2 * Cin), lambda n: (n, 0, 0, 0, 0)),
            pl.BlockSpec((9 * Cin, Cmid), lambda n: (0, 0)),
        ],
        out_specs=(
            pl.BlockSpec((1, Hp, Wp, Cmid), lambda n: (n, 0, 0, 0)),
            pl.BlockSpec((1, 2, Cmid), lambda n: (n, 0, 0)),
        ),
        out_shape=(
            jax.ShapeDtypeStruct((N, Hp, Wp, Cmid), compute_dtype),
            jax.ShapeDtypeStruct((N, 2, Cmid), jnp.float32),
        ),
        scratch_shapes=[
            pltpu.VMEM((Hp + 2, Wp + 2, Cin), compute_dtype),    # padded activation
            pltpu.VMEM((Hp * Wp, 9 * Cin), compute_dtype),       # im2col patch
        ],
        compiler_params=pltpu.CompilerParams(
            dimension_semantics=("parallel",), vmem_limit_bytes=vmem1),
    )(x5, w1m)

    scale1, shift1 = _bn_affine(stats1, g1, b1)

    # ---------------- pass 2: BN1+ReLU + conv2 (+ BN2 partial stats) ----------
    vmem2 = _vmem_limit(
        2 * _nbytes((1, Hp, Wp, Cmid), compute_dtype),
        2 * _nbytes((1, Hp, Wp, Cout), compute_dtype),
        2 * _nbytes((1, 2, Cout), jnp.float32),
        _nbytes((9 * Cmid, Cout), compute_dtype),
        _nbytes((Hp + 2, Wp + 2, Cmid), compute_dtype),
        _nbytes((Hp * Wp, 9 * Cmid), compute_dtype),
        _nbytes((Hp * Wp, Cout), jnp.float32),
    )
    y2_raw, stats2 = pl.pallas_call(
        _bn1_conv2_kernel,
        grid=(N,),
        in_specs=[
            pl.BlockSpec((1, Hp, Wp, Cmid), lambda n: (n, 0, 0, 0)),
            pl.BlockSpec((9 * Cmid, Cout), lambda n: (0, 0)),
            pl.BlockSpec((1, Cmid), lambda n: (0, 0)),
            pl.BlockSpec((1, Cmid), lambda n: (0, 0)),
        ],
        out_specs=(
            pl.BlockSpec((1, Hp, Wp, Cout), lambda n: (n, 0, 0, 0)),
            pl.BlockSpec((1, 2, Cout), lambda n: (n, 0, 0)),
        ),
        out_shape=(
            jax.ShapeDtypeStruct((N, Hp, Wp, Cout), compute_dtype),
            jax.ShapeDtypeStruct((N, 2, Cout), jnp.float32),
        ),
        scratch_shapes=[
            pltpu.VMEM((Hp + 2, Wp + 2, Cmid), compute_dtype),
            pltpu.VMEM((Hp * Wp, 9 * Cmid), compute_dtype),
        ],
        compiler_params=pltpu.CompilerParams(
            dimension_semantics=("parallel",), vmem_limit_bytes=vmem2),
    )(y1_raw, w2m, scale1, shift1)

    # ---------------- BN2 + ReLU, fused by XLA into the NCHW output pass ------
    scale2, shift2 = _bn_affine(stats2, g2, b2)
    y2 = y2_raw.astype(jnp.float32)
    out_nhwc = jnp.maximum(y2 * scale2.reshape(1, 1, 1, Cout)
                           + shift2.reshape(1, 1, 1, Cout), 0.0)
    return jnp.transpose(out_nhwc, (0, 3, 1, 2))


# ----------------------------- pure-JAX reference ----------------------------

def down_reference(x_nchw, params):
    w1, g1, b1, w2, g2, b2 = params
    xp = jax.lax.reduce_window(x_nchw, -jnp.inf, jax.lax.max,
                               (1, 1, 2, 2), (1, 1, 2, 2), 'VALID')

    def conv(x, w):  # w is (3, 3, Cin, Cout) == HWIO
        return jax.lax.conv_general_dilated(
            x, w, window_strides=(1, 1), padding=((1, 1), (1, 1)),
            dimension_numbers=('NCHW', 'HWIO', 'NCHW'))

    def bnrelu(x, g, b):
        mean = jnp.mean(x, axis=(0, 2, 3), keepdims=True)
        var = jnp.mean((x - mean) ** 2, axis=(0, 2, 3), keepdims=True)
        y = (x - mean) / jnp.sqrt(var + BN_EPS)
        y = y * g.reshape(1, -1, 1, 1) + b.reshape(1, -1, 1, 1)
        return jnp.maximum(y, 0.0)

    y = bnrelu(conv(xp, w1), g1, b1)
    y = bnrelu(conv(y, w2), g2, b2)
    return y


# ----------------------------- main ------------------------------------------

if __name__ == "__main__":
    key = jax.random.PRNGKey(0)
    k_w1, k_w2, k_g1, k_b1, k_g2, k_b2, k_x = jax.random.split(key, 7)

    N, Cin, H, W = 2, 4, 16, 16
    Cout = 8  # Down(in_channels=4, out_channels=8, depthwise=False)

    # Torch Conv2d weights stored directly in HWIO = (3, 3, Cin, Cout).
    w1 = jax.random.normal(k_w1, (3, 3, Cin, Cout), jnp.float32) * 0.1
    w2 = jax.random.normal(k_w2, (3, 3, Cout, Cout), jnp.float32) * 0.1
    g1 = 1.0 + 0.1 * jax.random.normal(k_g1, (1, Cout), jnp.float32)
    b1 = 0.1 * jax.random.normal(k_b1, (1, Cout), jnp.float32)
    g2 = 1.0 + 0.1 * jax.random.normal(k_g2, (1, Cout), jnp.float32)
    b2 = 0.1 * jax.random.normal(k_b2, (1, Cout), jnp.float32)
    params = (w1, g1, b1, w2, g2, b2)

    x = jax.random.normal(k_x, (N, Cin, H, W), jnp.float32)

    ref = jax.block_until_ready(down_reference(x, params))

    # Exact-semantics check: everything (operands, intermediates) stays f32.
    out_f32 = jax.block_until_ready(down_forward(x, params, compute_dtype=jnp.float32))
    assert out_f32.shape == (N, Cout, H // 2, W // 2), out_f32.shape
    assert jnp.allclose(out_f32, ref, atol=3e-3, rtol=3e-3), \
        float(jnp.max(jnp.abs(out_f32 - ref)))

    # Performance mode: bf16 operands/scratches/intermediates, f32 accumulation
    # and f32 BatchNorm statistics / element-wise math.
    out_bf16 = jax.block_until_ready(down_forward(x, params, compute_dtype=jnp.bfloat16))
    assert out_bf16.shape == (N, Cout, H // 2, W // 2), out_bf16.shape
    assert jnp.allclose(out_bf16, ref, atol=1e-1, rtol=5e-2), \
        float(jnp.max(jnp.abs(out_bf16 - ref)))

    print("KERNEL_OK")
</pallas_src>

<mosaic_0001>
module attributes {stable_mosaic.version = 11 : i64} {
  func.func @_pool_conv1_kernel(%arg0: i32, %arg1: memref<1x8x2x8x8xf32, #tpu.memory_space<vmem>>, %arg2: memref<36x8xf32, #tpu.memory_space<vmem>>, %arg3: memref<1x8x8x8xf32, #tpu.memory_space<vmem>>, %arg4: memref<1x2x8xf32, #tpu.memory_space<vmem>>, %arg5: memref<10x10x4xf32, #tpu.memory_space<vmem>>, %arg6: memref<64x36xf32, #tpu.memory_space<vmem>>) attributes {dimension_semantics = [#tpu.dimension_semantics<parallel>], iteration_bounds = array<i64: 2>, scalar_prefetch = 0 : i64, scratch_operands = 2 : i64, tpu.core_type = #tpu.core_type<tc>, window_params = [{transform_indices = @transform_0, window_bounds = array<i64: 1, 8, 2, 8, 8>}, {pipeline_mode = #tpu.pipeline_mode<synchronous>, transform_indices = @transform_1, window_bounds = array<i64: 36, 8>}, {transform_indices = @transform_2, window_bounds = array<i64: 1, 8, 8, 8>}, {transform_indices = @transform_3, window_bounds = array<i64: 1, 2, 8>}]} {
    %c0 = arith.constant 0 : index
    %c0_0 = arith.constant 0 : index
    %c0_1 = arith.constant 0 : index
    %c0_2 = arith.constant 0 : index
    %c0_3 = arith.constant 0 : index
    %0 = vector.load %arg1[%c0, %c0_0, %c0_1, %c0_2, %c0_3] : memref<1x8x2x8x8xf32, #tpu.memory_space<vmem>>, vector<1x8x2x8x8xf32>
    %1 = vector.extract_strided_slice %0 {offsets = [0, 0, 0, 0, 0], sizes = [1, 8, 1, 8, 8], strides = [1, 1, 1, 1, 1]} : vector<1x8x2x8x8xf32> to vector<1x8x1x8x8xf32>
    %2 = vector.shape_cast %1 : vector<1x8x1x8x8xf32> to vector<1x8x8x8xf32>
    %3 = vector.extract_strided_slice %0 {offsets = [0, 0, 1, 0, 0], sizes = [1, 8, 1, 8, 8], strides = [1, 1, 1, 1, 1]} : vector<1x8x2x8x8xf32> to vector<1x8x1x8x8xf32>
    %4 = vector.shape_cast %3 : vector<1x8x1x8x8xf32> to vector<1x8x8x8xf32>
    %5 = arith.maximumf %2, %4 : vector<1x8x8x8xf32>
    %6 = vector.extract_strided_slice %5 {offsets = [0, 0, 0, 0], sizes = [1, 8, 8, 4], strides = [1, 1, 1, 1]} : vector<1x8x8x8xf32> to vector<1x8x8x4xf32>
    %7 = vector.extract_strided_slice %5 {offsets = [0, 0, 0, 4], sizes = [1, 8, 8, 4], strides = [1, 1, 1, 1]} : vector<1x8x8x8xf32> to vector<1x8x8x4xf32>
    %8 = arith.maximumf %6, %7 : vector<1x8x8x4xf32>
    %cst = arith.constant 0.000000e+00 : f32
    %9 = vector.broadcast %cst : f32 to vector<1x10x4xf32>
    %c0_4 = arith.constant 0 : index
    %c0_5 = arith.constant 0 : index
    %c0_6 = arith.constant 0 : index
    %10 = vector.load %arg5[%c0_4, %c0_5, %c0_6] : memref<10x10x4xf32, #tpu.memory_space<vmem>>, vector<1x10x4xf32>
    tpu.vector_store %arg5[%c0_4, %c0_5, %c0_6], %9 {strides = array<i32>} : memref<10x10x4xf32, #tpu.memory_space<vmem>>, vector<1x10x4xf32>,
    %cst_7 = arith.constant 0.000000e+00 : f32
    %11 = vector.broadcast %cst_7 : f32 to vector<1x10x4xf32>
    %c9 = arith.constant 9 : index
    %c0_8 = arith.constant 0 : index
    %c0_9 = arith.constant 0 : index
    %12 = vector.load %arg5[%c9, %c0_8, %c0_9] : memref<10x10x4xf32, #tpu.memory_space<vmem>>, vector<1x10x4xf32>
    tpu.vector_store %arg5[%c9, %c0_8, %c0_9], %11 {strides = array<i32>} : memref<10x10x4xf32, #tpu.memory_space<vmem>>, vector<1x10x4xf32>,
    %cst_10 = arith.constant 0.000000e+00 : f32
    %13 = vector.broadcast %cst_10 : f32 to vector<10x1x4xf32>
    %c0_11 = arith.constant 0 : index
    %c0_12 = arith.constant 0 : index
    %c0_13 = arith.constant 0 : index
    %14 = vector.load %arg5[%c0_11, %c0_12, %c0_13] : memref<10x10x4xf32, #tpu.memory_space<vmem>>, vector<10x1x4xf32>
    tpu.vector_store %arg5[%c0_11, %c0_12, %c0_13], %13 {strides = array<i32>} : memref<10x10x4xf32, #tpu.memory_space<vmem>>, vector<10x1x4xf32>,
    %cst_14 = arith.constant 0.000000e+00 : f32
    %15 = vector.broadcast %cst_14 : f32 to vector<10x1x4xf32>
    %c0_15 = arith.constant 0 : index
    %c9_16 = arith.constant 9 : index
    %c0_17 = arith.constant 0 : index
    %16 = vector.load %arg5[%c0_15, %c9_16, %c0_17] : memref<10x10x4xf32, #tpu.memory_space<vmem>>, vector<10x1x4xf32>
    tpu.vector_store %arg5[%c0_15, %c9_16, %c0_17], %15 {strides = array<i32>} : memref<10x10x4xf32, #tpu.memory_space<vmem>>, vector<10x1x4xf32>,
    %17 = vector.shape_cast %8 : vector<1x8x8x4xf32> to vector<8x8x4xf32>
    %c1 = arith.constant 1 : index
    %c1_18 = arith.constant 1 : index
    %c0_19 = arith.constant 0 : index
    %18 = vector.load %arg5[%c1, %c1_18, %c0_19] : memref<10x10x4xf32, #tpu.memory_space<vmem>>, vector<8x8x4xf32>
    tpu.vector_store %arg5[%c1, %c1_18, %c0_19], %17 {strides = array<i32>} : memref<10x10x4xf32, #tpu.memory_space<vmem>>, vector<8x8x4xf32>,
    %c0_20 = arith.constant 0 : index
    %c0_21 = arith.constant 0 : index
    %c0_22 = arith.constant 0 : index
    %19 = vector.load %arg5[%c0_20, %c0_21, %c0_22] : memref<10x10x4xf32, #tpu.memory_space<vmem>>, vector<8x8x4xf32>
    %20 = vector.shape_cast %19 : vector<8x8x4xf32> to vector<64x4xf32>
    %c0_23 = arith.constant 0 : index
    %c0_24 = arith.constant 0 : index
    %21 = vector.load %arg6[%c0_23, %c0_24] : memref<64x36xf32, #tpu.memory_space<vmem>>, vector<64x4xf32>
    tpu.vector_store %arg6[%c0_23, %c0_24], %20 {strides = array<i32>} : memref<64x36xf32, #tpu.memory_space<vmem>>, vector<64x4xf32>,
    %c0_25 = arith.constant 0 : index
    %c1_26 = arith.constant 1 : index
    %c0_27 = arith.constant 0 : index
    %22 = vector.load %arg5[%c0_25, %c1_26, %c0_27] : memref<10x10x4xf32, #tpu.memory_space<vmem>>, vector<8x8x4xf32>
    %23 = vector.shape_cast %22 : vector<8x8x4xf32> to vector<64x4xf32>
    %c0_28 = arith.constant 0 : index
    %c4 = arith.constant 4 : index
    %24 = vector.load %arg6[%c0_28, %c4] : memref<64x36xf32, #tpu.memory_space<vmem>>, vector<64x4xf32>
    tpu.vector_store %arg6[%c0_28, %c4], %23 {strides = array<i32>} : memref<64x36xf32, #tpu.memory_space<vmem>>, vector<64x4xf32>,
    %c0_29 = arith.constant 0 : index
    %c2 = arith.constant 2 : index
    %c0_30 = arith.constant 0 : index
    %25 = vector.load %arg5[%c0_29, %c2, %c0_30] : memref<10x10x4xf32, #tpu.memory_space<vmem>>, vector<8x8x4xf32>
    %26 = vector.shape_cast %25 : vector<8x8x4xf32> to vector<64x4xf32>
    %c0_31 = arith.constant 0 : index
    %c8 = arith.constant 8 : index
    %27 = vector.load %arg6[%c0_31, %c8] : memref<64x36xf32, #tpu.memory_space<vmem>>, vector<64x4xf32>
    tpu.vector_store %arg6[%c0_31, %c8], %26 {strides = array<i32>} : memref<64x36xf32, #tpu.memory_space<vmem>>, vector<64x4xf32>,
    %c1_32 = arith.constant 1 : index
    %c0_33 = arith.constant 0 : index
    %c0_34 = arith.constant 0 : index
    %28 = vector.load %arg5[%c1_32, %c0_33, %c0_34] : memref<10x10x4xf32, #tpu.memory_space<vmem>>, vector<8x8x4xf32>
    %29 = vector.shape_cast %28 : vector<8x8x4xf32> to vector<64x4xf32>
    %c0_35 = arith.constant 0 : index
    %c12 = arith.constant 12 : index
    %30 = vector.load %arg6[%c0_35, %c12] : memref<64x36xf32, #tpu.memory_space<vmem>>, vector<64x4xf32>
    tpu.vector_store %arg6[%c0_35, %c12], %29 {strides = array<i32>} : memref<64x36xf32, #tpu.memory_space<vmem>>, vector<64x4xf32>,
    %c1_36 = arith.constant 1 : index
    %c1_37 = arith.constant 1 : index
    %c0_38 = arith.constant 0 : index
    %31 = vector.load %arg5[%c1_36, %c1_37, %c0_38] : memref<10x10x4xf32, #tpu.memory_space<vmem>>, vector<8x8x4xf32>
    %32 = vector.shape_cast %31 : vector<8x8x4xf32> to vector<64x4xf32>
    %c0_39 = arith.constant 0 : index
    %c16 = arith.constant 16 : index
    %33 = vector.load %arg6[%c0_39, %c16] : memref<64x36xf32, #tpu.memory_space<vmem>>, vector<64x4xf32>
    tpu.vector_store %arg6[%c0_39, %c16], %32 {strides = array<i32>} : memref<64x36xf32, #tpu.memory_space<vmem>>, vector<64x4xf32>,
    %c1_40 = arith.constant 1 : index
    %c2_41 = arith.constant 2 : index
    %c0_42 = arith.constant 0 : index
    %34 = vector.load %arg5[%c1_40, %c2_41, %c0_42] : memref<10x10x4xf32, #tpu.memory_space<vmem>>, vector<8x8x4xf32>
    %35 = vector.shape_cast %34 : vector<8x8x4xf32> to vector<64x4xf32>
    %c0_43 = arith.constant 0 : index
    %c20 = arith.constant 20 : index
    %36 = vector.load %arg6[%c0_43, %c20] : memref<64x36xf32, #tpu.memory_space<vmem>>, vector<64x4xf32>
    tpu.vector_store %arg6[%c0_43, %c20], %35 {strides = array<i32>} : memref<64x36xf32, #tpu.memory_space<vmem>>, vector<64x4xf32>,
    %c2_44 = arith.constant 2 : index
    %c0_45 = arith.constant 0 : index
    %c0_46 = arith.constant 0 : index
    %37 = vector.load %arg5[%c2_44, %c0_45, %c0_46] : memref<10x10x4xf32, #tpu.memory_space<vmem>>, vector<8x8x4xf32>
    %38 = vector.shape_cast %37 : vector<8x8x4xf32> to vector<64x4xf32>
    %c0_47 = arith.constant 0 : index
    %c24 = arith.constant 24 : index
    %39 = vector.load %arg6[%c0_47, %c24] : memref<64x36xf32, #tpu.memory_space<vmem>>, vector<64x4xf32>
    tpu.vector_store %arg6[%c0_47, %c24], %38 {strides = array<i32>} : memref<64x36xf32, #tpu.memory_space<vmem>>, vector<64x4xf32>,
    %c2_48 = arith.constant 2 : index
    %c1_49 = arith.constant 1 : index
    %c0_50 = arith.constant 0 : index
    %40 = vector.load %arg5[%c2_48, %c1_49, %c0_50] : memref<10x10x4xf32, #tpu.memory_space<vmem>>, vector<8x8x4xf32>
    %41 = vector.shape_cast %40 : vector<8x8x4xf32> to vector<64x4xf32>
    %c0_51 = arith.constant 0 : index
    %c28 = arith.constant 28 : index
    %42 = vector.load %arg6[%c0_51, %c28] : memref<64x36xf32, #tpu.memory_space<vmem>>, vector<64x4xf32>
    tpu.vector_store %arg6[%c0_51, %c28], %41 {strides = array<i32>} : memref<64x36xf32, #tpu.memory_space<vmem>>, vector<64x4xf32>,
    %c2_52 = arith.constant 2 : index
    %c2_53 = arith.constant 2 : index
    %c0_54 = arith.constant 0 : index
    %43 = vector.load %arg5[%c2_52, %c2_53, %c0_54] : memref<10x10x4xf32, #tpu.memory_space<vmem>>, vector<8x8x4xf32>
    %44 = vector.shape_cast %43 : vector<8x8x4xf32> to vector<64x4xf32>
    %c0_55 = arith.constant 0 : index
    %c32 = arith.constant 32 : index
    %45 = vector.load %arg6[%c0_55, %c32] : memref<64x36xf32, #tpu.memory_space<vmem>>, vector<64x4xf32>
    tpu.vector_store %arg6[%c0_55, %c32], %44 {strides = array<i32>} : memref<64x36xf32, #tpu.memory_space<vmem>>, vector<64x4xf32>,
    %c0_56 = arith.constant 0 : index
    %c0_57 = arith.constant 0 : index
    %46 = vector.load %arg6[%c0_56, %c0_57] : memref<64x36xf32, #tpu.memory_space<vmem>>, vector<64x36xf32>
    %c0_58 = arith.constant 0 : index
    %c0_59 = arith.constant 0 : index
    %47 = vector.load %arg2[%c0_58, %c0_59] : memref<36x8xf32, #tpu.memory_space<vmem>>, vector<36x8xf32>
    %cst_60 = arith.constant dense<0.000000e+00> : vector<64x8xf32>
    %48 = tpu.matmul %46, %47, %cst_60 {dimension_numbers = #tpu.dot_dimension_numbers<[1], [0], [0], [1], [0, 0, 1, 1], [], []>} : vector<64x36xf32>, vector<36x8xf32>, vector<64x8xf32> -> vector<64x8xf32>
    %49 = vector.shape_cast %48 : vector<64x8xf32> to vector<1x8x8x8xf32>
    %c0_61 = arith.constant 0 : index
    %c0_62 = arith.constant 0 : index
    %c0_63 = arith.constant 0 : index
    %c0_64 = arith.constant 0 : index
    %50 = vector.load %arg3[%c0_61, %c0_62, %c0_63, %c0_64] : memref<1x8x8x8xf32, #tpu.memory_space<vmem>>, vector<1x8x8x8xf32>
    tpu.vector_store %arg3[%c0_61, %c0_62, %c0_63, %c0_64], %49 {strides = array<i32>} : memref<1x8x8x8xf32, #tpu.memory_space<vmem>>, vector<1x8x8x8xf32>,
    %cst_65 = arith.constant dense<0.000000e+00> : vector<8xf32>
    %51 = vector.multi_reduction <add>, %48, %cst_65 [0] : vector<64x8xf32> to vector<8xf32>
    %52 = vector.shape_cast %51 : vector<8xf32> to vector<1x8xf32>
    %53 = vector.shape_cast %52 : vector<1x8xf32> to vector<1x1x8xf32>
    %c0_66 = arith.constant 0 : index
    %c0_67 = arith.constant 0 : index
    %c0_68 = arith.constant 0 : index
    %54 = vector.load %arg4[%c0_66, %c0_67, %c0_68] : memref<1x2x8xf32, #tpu.memory_space<vmem>>, vector<1x1x8xf32>
    tpu.vector_store %arg4[%c0_66, %c0_67, %c0_68], %53 {strides = array<i32>} : memref<1x2x8xf32, #tpu.memory_space<vmem>>, vector<1x1x8xf32>,
    %55 = arith.mulf %48, %48 : vector<64x8xf32>
    %cst_69 = arith.constant dense<0.000000e+00> : vector<8xf32>
    %56 = vector.multi_reduction <add>, %55, %cst_69 [0] : vector<64x8xf32> to vector<8xf32>
    %57 = vector.shape_cast %56 : vector<8xf32> to vector<1x8xf32>
    %58 = vector.shape_cast %57 : vector<1x8xf32> to vector<1x1x8xf32>
    %c0_70 = arith.constant 0 : index
    %c1_71 = arith.constant 1 : index
    %c0_72 = arith.constant 0 : index
    %59 = vector.load %arg4[%c0_70, %c1_71, %c0_72] : memref<1x2x8xf32, #tpu.memory_space<vmem>>, vector<1x1x8xf32>
    tpu.vector_store %arg4[%c0_70, %c1_71, %c0_72], %58 {strides = array<i32>} : memref<1x2x8xf32, #tpu.memory_space<vmem>>, vector<1x1x8xf32>,
    return
  }
  func.func @transform_0(%arg0: i32) -> (i32, i32, i32, i32, i32) {
    %c0_i32 = arith.constant 0 : i32
    %c0_i32_0 = arith.constant 0 : i32
    %c0_i32_1 = arith.constant 0 : i32
    %c0_i32_2 = arith.constant 0 : i32
    %c0_i32_3 = arith.constant 0 : i32
    return %arg0, %c0_i32, %c0_i32_0, %c0_i32_1, %c0_i32_2 : i32, i32, i32, i32, i32
  }
  func.func @transform_1(%arg0: i32) -> (i32, i32) {
    %c0_i32 = arith.constant 0 : i32
    %c0_i32_0 = arith.constant 0 : i32
    %c0_i32_1 = arith.constant 0 : i32
    return %c0_i32, %c0_i32_0 : i32, i32
  }
  func.func @transform_2(%arg0: i32) -> (i32, i32, i32, i32) {
    %c0_i32 = arith.constant 0 : i32
    %c0_i32_0 = arith.constant 0 : i32
    %c0_i32_1 = arith.constant 0 : i32
    %c0_i32_2 = arith.constant 0 : i32
    return %arg0, %c0_i32, %c0_i32_0, %c0_i32_1 : i32, i32, i32, i32
  }
  func.func @transform_3(%arg0: i32) -> (i32, i32, i32) {
    %c0_i32 = arith.constant 0 : i32
    %c0_i32_0 = arith.constant 0 : i32
    %c0_i32_1 = arith.constant 0 : i32
    return %arg0, %c0_i32, %c0_i32_0 : i32, i32, i32
  }
}

module attributes {stable_mosaic.version = 11 : i64} {
  func.func @_bn1_conv2_kernel(%arg0: i32, %arg1: memref<1x8x8x8xf32, #tpu.memory_space<vmem>>, %arg2: memref<72x8xf32, #tpu.memory_space<vmem>>, %arg3: memref<1x8xf32, #tpu.memory_space<vmem>>, %arg4: memref<1x8xf32, #tpu.memory_space<vmem>>, %arg5: memref<1x8x8x8xf32, #tpu.memory_space<vmem>>, %arg6: memref<1x2x8xf32, #tpu.memory_space<vmem>>, %arg7: memref<10x10x8xf32, #tpu.memory_space<vmem>>, %arg8: memref<64x72xf32, #tpu.memory_space<vmem>>) attributes {dimension_semantics = [#tpu.dimension_semantics<parallel>], iteration_bounds = array<i64: 2>, scalar_prefetch = 0 : i64, scratch_operands = 2 : i64, tpu.core_type = #tpu.core_type<tc>, window_params = [{transform_indices = @transform_0, window_bounds = array<i64: 1, 8, 8, 8>}, {pipeline_mode = #tpu.pipeline_mode<synchronous>, transform_indices = @transform_1, window_bounds = array<i64: 72, 8>}, {pipeline_mode = #tpu.pipeline_mode<synchronous>, transform_indices = @transform_2, window_bounds = array<i64: 1, 8>}, {pipeline_mode = #tpu.pipeline_mode<synchronous>, transform_indices = @transform_3, window_bounds = array<i64: 1, 8>}, {transform_indices = @transform_4, window_bounds = array<i64: 1, 8, 8, 8>}, {transform_indices = @transform_5, window_bounds = array<i64: 1, 2, 8>}]} {
    %c0 = arith.constant 0 : index
    %c0_0 = arith.constant 0 : index
    %c0_1 = arith.constant 0 : index
    %c0_2 = arith.constant 0 : index
    %0 = vector.load %arg1[%c0, %c0_0, %c0_1, %c0_2] : memref<1x8x8x8xf32, #tpu.memory_space<vmem>>, vector<1x8x8x8xf32>
    %1 = vector.shape_cast %0 : vector<1x8x8x8xf32> to vector<64x8xf32>
    %c0_3 = arith.constant 0 : index
    %c0_4 = arith.constant 0 : index
    %2 = vector.load %arg3[%c0_3, %c0_4] : memref<1x8xf32, #tpu.memory_space<vmem>>, vector<1x8xf32>
    %3 = vector.broadcast %2 : vector<1x8xf32> to vector<64x8xf32>
    %4 = arith.mulf %1, %3 : vector<64x8xf32>
    %c0_5 = arith.constant 0 : index
    %c0_6 = arith.constant 0 : index
    %5 = vector.load %arg4[%c0_5, %c0_6] : memref<1x8xf32, #tpu.memory_space<vmem>>, vector<1x8xf32>
    %6 = vector.broadcast %5 : vector<1x8xf32> to vector<64x8xf32>
    %7 = arith.addf %4, %6 : vector<64x8xf32>
    %cst = arith.constant 0.000000e+00 : f32
    %8 = vector.broadcast %cst : f32 to vector<64x8xf32>
    %9 = arith.maximumf %7, %8 : vector<64x8xf32>
    %cst_7 = arith.constant 0.000000e+00 : f32
    %10 = vector.broadcast %cst_7 : f32 to vector<1x10x8xf32>
    %c0_8 = arith.constant 0 : index
    %c0_9 = arith.constant 0 : index
    %c0_10 = arith.constant 0 : index
    %11 = vector.load %arg7[%c0_8, %c0_9, %c0_10] : memref<10x10x8xf32, #tpu.memory_space<vmem>>, vector<1x10x8xf32>
    tpu.vector_store %arg7[%c0_8, %c0_9, %c0_10], %10 {strides = array<i32>} : memref<10x10x8xf32, #tpu.memory_space<vmem>>, vector<1x10x8xf32>,
    %cst_11 = arith.constant 0.000000e+00 : f32
    %12 = vector.broadcast %cst_11 : f32 to vector<1x10x8xf32>
    %c9 = arith.constant 9 : index
    %c0_12 = arith.constant 0 : index
    %c0_13 = arith.constant 0 : index
    %13 = vector.load %arg7[%c9, %c0_12, %c0_13] : memref<10x10x8xf32, #tpu.memory_space<vmem>>, vector<1x10x8xf32>
    tpu.vector_store %arg7[%c9, %c0_12, %c0_13], %12 {strides = array<i32>} : memref<10x10x8xf32, #tpu.memory_space<vmem>>, vector<1x10x8xf32>,
    %cst_14 = arith.constant 0.000000e+00 : f32
    %14 = vector.broadcast %cst_14 : f32 to vector<10x1x8xf32>
    %c0_15 = arith.constant 0 : index
    %c0_16 = arith.constant 0 : index
    %c0_17 = arith.constant 0 : index
    %15 = vector.load %arg7[%c0_15, %c0_16, %c0_17] : memref<10x10x8xf32, #tpu.memory_space<vmem>>, vector<10x1x8xf32>
    tpu.vector_store %arg7[%c0_15, %c0_16, %c0_17], %14 {strides = array<i32>} : memref<10x10x8xf32, #tpu.memory_space<vmem>>, vector<10x1x8xf32>,
    %cst_18 = arith.constant 0.000000e+00 : f32
    %16 = vector.broadcast %cst_18 : f32 to vector<10x1x8xf32>
    %c0_19 = arith.constant 0 : index
    %c9_20 = arith.constant 9 : index
    %c0_21 = arith.constant 0 : index
    %17 = vector.load %arg7[%c0_19, %c9_20, %c0_21] : memref<10x10x8xf32, #tpu.memory_space<vmem>>, vector<10x1x8xf32>
    tpu.vector_store %arg7[%c0_19, %c9_20, %c0_21], %16 {strides = array<i32>} : memref<10x10x8xf32, #tpu.memory_space<vmem>>, vector<10x1x8xf32>,
    %18 = vector.shape_cast %9 : vector<64x8xf32> to vector<8x8x8xf32>
    %c1 = arith.constant 1 : index
    %c1_22 = arith.constant 1 : index
    %c0_23 = arith.constant 0 : index
    %19 = vector.load %arg7[%c1, %c1_22, %c0_23] : memref<10x10x8xf32, #tpu.memory_space<vmem>>, vector<8x8x8xf32>
    tpu.vector_store %arg7[%c1, %c1_22, %c0_23], %18 {strides = array<i32>} : memref<10x10x8xf32, #tpu.memory_space<vmem>>, vector<8x8x8xf32>,
    %c0_24 = arith.constant 0 : index
    %c0_25 = arith.constant 0 : index
    %c0_26 = arith.constant 0 : index
    %20 = vector.load %arg7[%c0_24, %c0_25, %c0_26] : memref<10x10x8xf32, #tpu.memory_space<vmem>>, vector<8x8x8xf32>
    %21 = vector.shape_cast %20 : vector<8x8x8xf32> to vector<64x8xf32>
    %c0_27 = arith.constant 0 : index
    %c0_28 = arith.constant 0 : index
    %22 = vector.load %arg8[%c0_27, %c0_28] : memref<64x72xf32, #tpu.memory_space<vmem>>, vector<64x8xf32>
    tpu.vector_store %arg8[%c0_27, %c0_28], %21 {strides = array<i32>} : memref<64x72xf32, #tpu.memory_space<vmem>>, vector<64x8xf32>,
    %c0_29 = arith.constant 0 : index
    %c1_30 = arith.constant 1 : index
    %c0_31 = arith.constant 0 : index
    %23 = vector.load %arg7[%c0_29, %c1_30, %c0_31] : memref<10x10x8xf32, #tpu.memory_space<vmem>>, vector<8x8x8xf32>
    %24 = vector.shape_cast %23 : vector<8x8x8xf32> to vector<64x8xf32>
    %c0_32 = arith.constant 0 : index
    %c8 = arith.constant 8 : index
    %25 = vector.load %arg8[%c0_32, %c8] : memref<64x72xf32, #tpu.memory_space<vmem>>, vector<64x8xf32>
    tpu.vector_store %arg8[%c0_32, %c8], %24 {strides = array<i32>} : memref<64x72xf32, #tpu.memory_space<vmem>>, vector<64x8xf32>,
    %c0_33 = arith.constant 0 : index
    %c2 = arith.constant 2 : index
    %c0_34 = arith.constant 0 : index
    %26 = vector.load %arg7[%c0_33, %c2, %c0_34] : memref<10x10x8xf32, #tpu.memory_space<vmem>>, vector<8x8x8xf32>
    %27 = vector.shape_cast %26 : vector<8x8x8xf32> to vector<64x8xf32>
    %c0_35 = arith.constant 0 : index
    %c16 = arith.constant 16 : index
    %28 = vector.load %arg8[%c0_35, %c16] : memref<64x72xf32, #tpu.memory_space<vmem>>, vector<64x8xf32>
    tpu.vector_store %arg8[%c0_35, %c16], %27 {strides = array<i32>} : memref<64x72xf32, #tpu.memory_space<vmem>>, vector<64x8xf32>,
    %c1_36 = arith.constant 1 : index
    %c0_37 = arith.constant 0 : index
    %c0_38 = arith.constant 0 : index
    %29 = vector.load %arg7[%c1_36, %c0_37, %c0_38] : memref<10x10x8xf32, #tpu.memory_space<vmem>>, vector<8x8x8xf32>
    %30 = vector.shape_cast %29 : vector<8x8x8xf32> to vector<64x8xf32>
    %c0_39 = arith.constant 0 : index
    %c24 = arith.constant 24 : index
    %31 = vector.load %arg8[%c0_39, %c24] : memref<64x72xf32, #tpu.memory_space<vmem>>, vector<64x8xf32>
    tpu.vector_store %arg8[%c0_39, %c24], %30 {strides = array<i32>} : memref<64x72xf32, #tpu.memory_space<vmem>>, vector<64x8xf32>,
    %c1_40 = arith.constant 1 : index
    %c1_41 = arith.constant 1 : index
    %c0_42 = arith.constant 0 : index
    %32 = vector.load %arg7[%c1_40, %c1_41, %c0_42] : memref<10x10x8xf32, #tpu.memory_space<vmem>>, vector<8x8x8xf32>
    %33 = vector.shape_cast %32 : vector<8x8x8xf32> to vector<64x8xf32>
    %c0_43 = arith.constant 0 : index
    %c32 = arith.constant 32 : index
    %34 = vector.load %arg8[%c0_43, %c32] : memref<64x72xf32, #tpu.memory_space<vmem>>, vector<64x8xf32>
    tpu.vector_store %arg8[%c0_43, %c32], %33 {strides = array<i32>} : memref<64x72xf32, #tpu.memory_space<vmem>>, vector<64x8xf32>,
    %c1_44 = arith.constant 1 : index
    %c2_45 = arith.constant 2 : index
    %c0_46 = arith.constant 0 : index
    %35 = vector.load %arg7[%c1_44, %c2_45, %c0_46] : memref<10x10x8xf32, #tpu.memory_space<vmem>>, vector<8x8x8xf32>
    %36 = vector.shape_cast %35 : vector<8x8x8xf32> to vector<64x8xf32>
    %c0_47 = arith.constant 0 : index
    %c40 = arith.constant 40 : index
    %37 = vector.load %arg8[%c0_47, %c40] : memref<64x72xf32, #tpu.memory_space<vmem>>, vector<64x8xf32>
    tpu.vector_store %arg8[%c0_47, %c40], %36 {strides = array<i32>} : memref<64x72xf32, #tpu.memory_space<vmem>>, vector<64x8xf32>,
    %c2_48 = arith.constant 2 : index
    %c0_49 = arith.constant 0 : index
    %c0_50 = arith.constant 0 : index
    %38 = vector.load %arg7[%c2_48, %c0_49, %c0_50] : memref<10x10x8xf32, #tpu.memory_space<vmem>>, vector<8x8x8xf32>
    %39 = vector.shape_cast %38 : vector<8x8x8xf32> to vector<64x8xf32>
    %c0_51 = arith.constant 0 : index
    %c48 = arith.constant 48 : index
    %40 = vector.load %arg8[%c0_51, %c48] : memref<64x72xf32, #tpu.memory_space<vmem>>, vector<64x8xf32>
    tpu.vector_store %arg8[%c0_51, %c48], %39 {strides = array<i32>} : memref<64x72xf32, #tpu.memory_space<vmem>>, vector<64x8xf32>,
    %c2_52 = arith.constant 2 : index
    %c1_53 = arith.constant 1 : index
    %c0_54 = arith.constant 0 : index
    %41 = vector.load %arg7[%c2_52, %c1_53, %c0_54] : memref<10x10x8xf32, #tpu.memory_space<vmem>>, vector<8x8x8xf32>
    %42 = vector.shape_cast %41 : vector<8x8x8xf32> to vector<64x8xf32>
    %c0_55 = arith.constant 0 : index
    %c56 = arith.constant 56 : index
    %43 = vector.load %arg8[%c0_55, %c56] : memref<64x72xf32, #tpu.memory_space<vmem>>, vector<64x8xf32>
    tpu.vector_store %arg8[%c0_55, %c56], %42 {strides = array<i32>} : memref<64x72xf32, #tpu.memory_space<vmem>>, vector<64x8xf32>,
    %c2_56 = arith.constant 2 : index
    %c2_57 = arith.constant 2 : index
    %c0_58 = arith.constant 0 : index
    %44 = vector.load %arg7[%c2_56, %c2_57, %c0_58] : memref<10x10x8xf32, #tpu.memory_space<vmem>>, vector<8x8x8xf32>
    %45 = vector.shape_cast %44 : vector<8x8x8xf32> to vector<64x8xf32>
    %c0_59 = arith.constant 0 : index
    %c64 = arith.constant 64 : index
    %46 = vector.load %arg8[%c0_59, %c64] : memref<64x72xf32, #tpu.memory_space<vmem>>, vector<64x8xf32>
    tpu.vector_store %arg8[%c0_59, %c64], %45 {strides = array<i32>} : memref<64x72xf32, #tpu.memory_space<vmem>>, vector<64x8xf32>,
    %c0_60 = arith.constant 0 : index
    %c0_61 = arith.constant 0 : index
    %47 = vector.load %arg8[%c0_60, %c0_61] : memref<64x72xf32, #tpu.memory_space<vmem>>, vector<64x72xf32>
    %c0_62 = arith.constant 0 : index
    %c0_63 = arith.constant 0 : index
    %48 = vector.load %arg2[%c0_62, %c0_63] : memref<72x8xf32, #tpu.memory_space<vmem>>, vector<72x8xf32>
    %cst_64 = arith.constant dense<0.000000e+00> : vector<64x8xf32>
    %49 = tpu.matmul %47, %48, %cst_64 {dimension_numbers = #tpu.dot_dimension_numbers<[1], [0], [0], [1], [0, 0, 1, 1], [], []>} : vector<64x72xf32>, vector<72x8xf32>, vector<64x8xf32> -> vector<64x8xf32>
    %50 = vector.shape_cast %49 : vector<64x8xf32> to vector<1x8x8x8xf32>
    %c0_65 = arith.constant 0 : index
    %c0_66 = arith.constant 0 : index
    %c0_67 = arith.constant 0 : index
    %c0_68 = arith.constant 0 : index
    %51 = vector.load %arg5[%c0_65, %c0_66, %c0_67, %c0_68] : memref<1x8x8x8xf32, #tpu.memory_space<vmem>>, vector<1x8x8x8xf32>
    tpu.vector_store %arg5[%c0_65, %c0_66, %c0_67, %c0_68], %50 {strides = array<i32>} : memref<1x8x8x8xf32, #tpu.memory_space<vmem>>, vector<1x8x8x8xf32>,
    %cst_69 = arith.constant dense<0.000000e+00> : vector<8xf32>
    %52 = vector.multi_reduction <add>, %49, %cst_69 [0] : vector<64x8xf32> to vector<8xf32>
    %53 = vector.shape_cast %52 : vector<8xf32> to vector<1x8xf32>
    %54 = vector.shape_cast %53 : vector<1x8xf32> to vector<1x1x8xf32>
    %c0_70 = arith.constant 0 : index
    %c0_71 = arith.constant 0 : index
    %c0_72 = arith.constant 0 : index
    %55 = vector.load %arg6[%c0_70, %c0_71, %c0_72] : memref<1x2x8xf32, #tpu.memory_space<vmem>>, vector<1x1x8xf32>
    tpu.vector_store %arg6[%c0_70, %c0_71, %c0_72], %54 {strides = array<i32>} : memref<1x2x8xf32, #tpu.memory_space<vmem>>, vector<1x1x8xf32>,
    %56 = arith.mulf %49, %49 : vector<64x8xf32>
    %cst_73 = arith.constant dense<0.000000e+00> : vector<8xf32>
    %57 = vector.multi_reduction <add>, %56, %cst_73 [0] : vector<64x8xf32> to vector<8xf32>
    %58 = vector.shape_cast %57 : vector<8xf32> to vector<1x8xf32>
    %59 = vector.shape_cast %58 : vector<1x8xf32> to vector<1x1x8xf32>
    %c0_74 = arith.constant 0 : index
    %c1_75 = arith.constant 1 : index
    %c0_76 = arith.constant 0 : index
    %60 = vector.load %arg6[%c0_74, %c1_75, %c0_76] : memref<1x2x8xf32, #tpu.memory_space<vmem>>, vector<1x1x8xf32>
    tpu.vector_store %arg6[%c0_74, %c1_75, %c0_76], %59 {strides = array<i32>} : memref<1x2x8xf32, #tpu.memory_space<vmem>>, vector<1x1x8xf32>,
    return
  }
  func.func @transform_0(%arg0: i32) -> (i32, i32, i32, i32) {
    %c0_i32 = arith.constant 0 : i32
    %c0_i32_0 = arith.constant 0 : i32
    %c0_i32_1 = arith.constant 0 : i32
    %c0_i32_2 = arith.constant 0 : i32
    return %arg0, %c0_i32, %c0_i32_0, %c0_i32_1 : i32, i32, i32, i32
  }
  func.func @transform_1(%arg0: i32) -> (i32, i32) {
    %c0_i32 = arith.constant 0 : i32
    %c0_i32_0 = arith.constant 0 : i32
    %c0_i32_1 = arith.constant 0 : i32
    return %c0_i32, %c0_i32_0 : i32, i32
  }
  func.func @transform_2(%arg0: i32) -> (i32, i32) {
    %c0_i32 = arith.constant 0 : i32
    %c0_i32_0 = arith.constant 0 : i32
    %c0_i32_1 = arith.constant 0 : i32
    return %c0_i32, %c0_i32_0 : i32, i32
  }
  func.func @transform_3(%arg0: i32) -> (i32, i32) {
    %c0_i32 = arith.constant 0 : i32
    %c0_i32_0 = arith.constant 0 : i32
    %c0_i32_1 = arith.constant 0 : i32
    return %c0_i32, %c0_i32_0 : i32, i32
  }
  func.func @transform_4(%arg0: i32) -> (i32, i32, i32, i32) {
    %c0_i32 = arith.constant 0 : i32
    %c0_i32_0 = arith.constant 0 : i32
    %c0_i32_1 = arith.constant 0 : i32
    %c0_i32_2 = arith.constant 0 : i32
    return %arg0, %c0_i32, %c0_i32_0, %c0_i32_1 : i32, i32, i32, i32
  }
  func.func @transform_5(%arg0: i32) -> (i32, i32, i32) {
    %c0_i32 = arith.constant 0 : i32
    %c0_i32_0 = arith.constant 0 : i32
    %c0_i32_1 = arith.constant 0 : i32
    return %arg0, %c0_i32, %c0_i32_0 : i32, i32, i32
  }
}

</mosaic_0001>

<bundles_post_ra>
// kernel: down_forward.3
= control target key start
LH: loop header
LB: loop body
LE: loop exit
PB: predicated region body
PF: predicated region fallthrough
CT: control target
= control target key end

     0   :  { %s1066_s18 = smov 0   ;;  %s1457_s0 = inlined_call_operand.vmem [shape: f32[2,8,8,8], index: 0, kind: input, shape index: {}]   ;;  %s1458_s1 = inlined_call_operand.vmem [shape: f32[72,8], index: 1, kind: input, shape index: {}]   ;;  %s1459_s2 = inlined_call_operand.vmem [shape: f32[1,8], index: 2, kind: input, shape index: {}]   ;;  %s1460_s3 = inlined_call_operand.vmem [shape: f32[1,8], index: 3, kind: input, shape index: {}]   ;;  %s1461_s4 = inlined_call_operand.vmem [shape: f32[2,8,8,8], index: 4, kind: output, shape index: {0}]   ;;  %s1462_s5 = inlined_call_operand.vmem [shape: f32[2,2,8], index: 5, kind: output, shape index: {1}]  }
   0x1 LB: > { %s951_s19 = sadd.s32 4294967295, %s1025_s18   ;;  %p955_p0 = scmp.ge.s32.totalorder %s1025_s18, 1  ;;  %s1025_s18 = sphi %s1066_s18, %s16_s18  }
   0x2   : > { %p190_p1 = scmp.lt.s32.totalorder %s1025_s18, 3 }
   0x4   : > { %p191_p2 = pnand %p955_p0, %p190_p1 }
   0x5   : > { %p222_p3 = scmp.lt.s32.totalorder (!%p191_p2), %s951_s19, 1  ;;  %s1028_s26 = smov (!%p191_p2), 8  }
   0x6   : > { %194 = sbr.rel (%p191_p2) target bundleno = 479 (0x1df), region = 36  ;;  %s1029_s29 = smov (!%p191_p2), 16  }
   0x7   : > { %s1030_s30 = smov (!%p191_p2), 24   ;;  %s1031_s6 = smov (!%p191_p2), 32  }
   0x8   : > { %s1032_s7 = smov (!%p191_p2), 40   ;;  %s1033_s8 = smov (!%p191_p2), 48  }
   0x9   : > { %s1034_s9 = smov (!%p191_p2), 56   ;;  %s1035_s10 = smov (!%p191_p2), 64  }
   0xb   : > { %vm276_vm0 = vcmask 64512   ;;  %vm278_vm1 = vcmask 58368   ;;  %v1027_v0 = vmov 0.0   ;;  %vm283_vm2 = vcmask 57344   ;;  %s1464_s19 = smov (!%p222_p3, %s951_s19), 1 }
   0xc   : > { %277 = vst.msk [vmem:[#allocation2] sm:$0xff] %vm276_vm0, %v1027_v0  ;;  %s971_s20 = sshll.u32 %s1464_s19, 6  ;;  %v1094_v2 = vld [vmem:[%s1459_s2] ss:$0 sm:$0xff]  ;;  %vm369_vm3 = vcmask 130112   ;;  %vm418_vm4 = vcmask 195712  }
   0xd   : > { %279 = vst.msk [vmem:[#allocation2 + $0x8] sm:$0x3] %vm278_vm1, %v1027_v0  ;;  %s1087_s23 = scalar_lea.vmem %s1457_s0, %s971_s20  ;;  %v1108_v7 = vld [vmem:[%s1460_s3] ss:$0 sm:$0xff]  ;;  %vm467_vm5 = vcmask 261312   ;;  %vm516_vm6 = vcmask 326912  }
   0xe   : > { %284 = vst.msk [vmem:[#allocation2] sm:$0x1] %vm283_vm2, %v1027_v0  ;;  %v239_v3 = vld [vmem:[%s1087_s23 + $0x18] sm:$0xff]  ;;  %v237_v4 = vld [vmem:[%s1087_s23 + $0x8] sm:$0xff]  ;;  %v236_v5 = vld [vmem:[%s1087_s23] sm:$0xff]  ;;  %vm565_vm7 = vcmask 392512  }
   0xf   : > { %281 = vst.msk [vmem:[#allocation2 + $0x90] sm:$0xff] %vm276_vm0, %v1027_v0  ;;  %v251_v6 = vmul.f32 %v1094_v2, %v239_v3  ;;  %v240_v8 = vld [vmem:[%s1087_s23 + $0x20] sm:$0xff]  ;;  %v249_v9 = vmul.f32 %v1094_v2, %v237_v4  ;;  %v241_v10 = vld [vmem:[%s1087_s23 + $0x28] sm:$0xff]  ;;  %v248_v11 = vmul.f32 %v1094_v2, %v236_v5  ;;  %v238_v16 = vld [vmem:[%s1087_s23 + $0x10] sm:$0xff]  ;;  %vm615_vm8 = vcmask 458112  }
  0x10   : > { %282 = vst.msk [vmem:[#allocation2 + $0x98] sm:$0x3] %vm278_vm1, %v1027_v0  ;;  %v252_v12 = vmul.f32 %v1094_v2, %v240_v8  ;;  %v253_v14 = vmul.f32 %v1094_v2, %v241_v10  ;;  %v250_v18 = vmul.f32 %v1094_v2, %v238_v16  ;;  %v242_v29 = vld [vmem:[%s1087_s23 + $0x30] sm:$0xff]  ;;  %v243_v50 = vld [vmem:[%s1087_s23 + $0x38] sm:$0xff]  ;;  %vm664_vm9 = vcmask 523712  }
  0x11   : > { %285 = vst.msk [vmem:[#allocation2 + $0x10] sm:$0x1] %vm283_vm2, %v1027_v0  ;;  %v263_v13 = vadd.f32 %v1108_v7, %v251_v6  ;;  %v261_v15 = vadd.f32 %v1108_v7, %v249_v9  ;;  %v260_v17 = vadd.f32 %v1108_v7, %v248_v11  ;;  %v254_v30 = vmul.f32 %v1094_v2, %v242_v29  ;;  %v738_v6 = vld [vmem:[%s1458_s1 + $0x40] sm:$0xff]  ;;  %v737_v10 = vld [vmem:[%s1458_s1 + $0x38] sm:$0xff]  ;;  %v736_v11 = vld [vmem:[%s1458_s1 + $0x30] sm:$0xff] }
  0x12   : > { %286 = vst.msk [vmem:[#allocation2 + $0x20] sm:$0x1] %vm283_vm2, %v1027_v0  ;;  %v264_v19 = vadd.f32 %v1108_v7, %v252_v12  ;;  %v265_v22 = vadd.f32 %v1108_v7, %v253_v14  ;;  %v262_v24 = vadd.f32 %v1108_v7, %v250_v18  ;;  %v255_v51 = vmul.f32 %v1094_v2, %v243_v50  ;;  %v735_v12 = vld [vmem:[%s1458_s1 + $0x28] sm:$0xff]  ;;  %v732_v18 = vld [vmem:[%s1458_s1 + $0x10] sm:$0xff] }
  0x13   : > { %287 = vst.msk [vmem:[#allocation2 + $0x30] sm:$0x1] %vm283_vm2, %v1027_v0  ;;  %v271_v21 = vmax.f32 %v263_v13, 0.0  ;;  %v269_v23 = vmax.f32 %v261_v15, 0.0  ;;  %v268_v25 = vmax.f32 %v260_v17, 0.0  ;;  %v266_v34 = vadd.f32 %v1108_v7, %v254_v30  ;;  %771 = vmatpush.msra.mxu0 %v738_v6  ;;  %974 = vmatpush.msra.mxu2 %v738_v6  ;;  %v734_v13 = vld [vmem:[%s1458_s1 + $0x20] sm:$0xff] }
  0x14   : > { %v329_v1 = vld [vmem:[#allocation2 + $0x1] sm:$0xff]  ;;  %288 = vst.msk [vmem:[#allocation2 + $0x40] sm:$0x1] %vm283_vm2, %v1027_v0  ;;  %v272_v26 = vmax.f32 %v264_v19, 0.0  ;;  %v273_v27 = vmax.f32 %v265_v22, 0.0  ;;  %v270_v28 = vmax.f32 %v262_v24, 0.0  ;;  %v267_v52 = vadd.f32 %v1108_v7, %v255_v51  ;;  %973 = vmatpush.msra.mxu1 %v738_v6  ;;  %975 = vmatpush.msra.mxu3 %v738_v6 }
  0x15   : > { %345 = vrot.lane.b32.xlu0 %v329_v1, %s1028_s26  ;;  %289 = vst.msk [vmem:[#allocation2 + $0x50] sm:$0x1] %vm283_vm2, %v1027_v0  ;;  %v274_v37 = vmax.f32 %v266_v34, 0.0  ;;  %v313_v58 = vld [vmem:[#allocation2] sm:$0xff]  ;;  %772 = vmatpush.msra.mxu0 %v737_v10  ;;  %v733_v17 = vld [vmem:[%s1458_s1 + $0x18] sm:$0xff]  ;;  %v731_v19 = vld [vmem:[%s1458_s1 + $0x8] sm:$0xff] }
  0x16   : > { %290 = vst.msk [vmem:[#allocation2 + $0x60] sm:$0x1] %vm283_vm2, %v1027_v0  ;;  %v275_v53 = vmax.f32 %v267_v52, 0.0  ;;  %977 = vmatpush.msra.mxu2 %v737_v10  ;;  %976 = vmatpush.msra.mxu1 %v737_v10  ;;  %vm713_vm10 = vcmask 589312   ;;  %vm739_vm11 = vcmask 588800  }
  0x17   : > { %291 = vst.msk [vmem:[#allocation2 + $0x70] sm:$0x1] %vm283_vm2, %v1027_v0  ;;  %978 = vmatpush.msra.mxu3 %v737_v10  ;;  %773 = vmatpush.msra.mxu0 %v736_v11 }
  0x18   : > { %292 = vst.msk [vmem:[#allocation2 + $0x80] sm:$0x1] %vm283_vm2, %v1027_v0  ;;  %980 = vmatpush.msra.mxu2 %v736_v11  ;;  %979 = vmatpush.msra.mxu1 %v736_v11 }
  0x19   : > { %294 = vst.msk [vmem:[#allocation2 + $0x9] sm:$0x1] %vm283_vm2, %v1027_v0  ;;  %981 = vmatpush.msra.mxu3 %v736_v11  ;;  %774 = vmatpush.msra.mxu0 %v735_v12 }
  0x1a   : > { %295 = vst.msk [vmem:[#allocation2 + $0x19] sm:$0x1] %vm283_vm2, %v1027_v0  ;;  %983 = vmatpush.msra.mxu2 %v735_v12  ;;  %982 = vmatpush.msra.mxu1 %v735_v12 }
  0x1b   : > { %296 = vst.msk [vmem:[#allocation2 + $0x29] sm:$0x1] %vm283_vm2, %v1027_v0  ;;  %775 = vmatpush.msra.mxu0 %v734_v13  ;;  %984 = vmatpush.msra.mxu3 %v735_v12 }
  0x1c   : > { %297 = vst.msk [vmem:[#allocation2 + $0x39] sm:$0x1] %vm283_vm2, %v1027_v0  ;;  %986 = vmatpush.msra.mxu2 %v734_v13  ;;  %985 = vmatpush.msra.mxu1 %v734_v13 }
  0x1d   : > { %298 = vst.msk [vmem:[#allocation2 + $0x49] sm:$0x1] %vm283_vm2, %v1027_v0  ;;  %776 = vmatpush.msra.mxu0 %v733_v17  ;;  %987 = vmatpush.msra.mxu3 %v734_v13 }
  0x1e   : > { %299 = vst.msk [vmem:[#allocation2 + $0x59] sm:$0x1] %vm283_vm2, %v1027_v0  ;;  %989 = vmatpush.msra.mxu2 %v733_v17  ;;  %988 = vmatpush.msra.mxu1 %v733_v17 }
  0x1f   : > { %300 = vst.msk [vmem:[#allocation2 + $0x69] sm:$0x1] %vm283_vm2, %v1027_v0  ;;  %777 = vmatpush.msra.mxu0 %v732_v18  ;;  %990 = vmatpush.msra.mxu3 %v733_v17 }
  0x20   : > { %301 = vst.msk [vmem:[#allocation2 + $0x79] sm:$0x1] %vm283_vm2, %v1027_v0  ;;  %v378_v20 = vld [vmem:[#allocation2 + $0x2] sm:$0xff]  ;;  %992 = vmatpush.msra.mxu2 %v732_v18  ;;  %991 = vmatpush.msra.mxu1 %v732_v18 }
  0x21   : > { %302 = vst.msk [vmem:[#allocation2 + $0x89] sm:$0x1] %vm283_vm2, %v1027_v0  ;;  %394 = vrot.lane.b32.xlu0 %v378_v20, %s1029_s29  ;;  %v730_v20 = vld [vmem:[%s1458_s1] sm:$0xff]  ;;  %778 = vmatpush.msra.mxu0 %v731_v19 }
  0x22   : > { %293 = vst.msk [vmem:[#allocation2 + $0x90] sm:$0x1] %vm283_vm2, %v1027_v0  ;;  %993 = vmatpush.msra.mxu3 %v732_v18  ;;  %995 = vmatpush.msra.mxu2 %v731_v19 }
  0x23   : > { %303 = vst.msk [vmem:[#allocation2 + $0x99] sm:$0x1] %vm283_vm2, %v1027_v0  ;;  %779 = vmatpush.msra.mxu0 %v730_v20  ;;  %994 = vmatpush.msra.mxu1 %v731_v19 }
  0x24   : > { %308 = vst.msk [vmem:[#allocation2 + $0x41] sm:$0xff] %vm276_vm0, %v271_v21  ;;  %996 = vmatpush.msra.mxu3 %v731_v19  ;;  %998 = vmatpush.msra.mxu2 %v730_v20 }
  0x25   : > { %306 = vst.msk [vmem:[#allocation2 + $0x21] sm:$0xff] %vm276_vm0, %v269_v23  ;;  %997 = vmatpush.msra.mxu1 %v730_v20 }
  0x26   : > { %305 = vst.msk [vmem:[#allocation2 + $0x11] sm:$0xff] %vm276_vm0, %v268_v25  ;;  %999 = vmatpush.msra.mxu3 %v730_v20 }
  0x27   : > { %309 = vst.msk [vmem:[#allocation2 + $0x51] sm:$0xff] %vm276_vm0, %v272_v26 }
  0x28   : > { %310 = vst.msk [vmem:[#allocation2 + $0x61] sm:$0xff] %vm276_vm0, %v273_v27 }
  0x29   : > { %307 = vst.msk [vmem:[#allocation2 + $0x31] sm:$0xff] %vm276_vm0, %v270_v28  ;;  %v582_v24 = vld [vmem:[#allocation2 + $0x90] sm:$0xff] }
  0x2a   : > { %311 = vst.msk [vmem:[#allocation2 + $0x71] sm:$0xff] %vm276_vm0, %v274_v37  ;;  %v680_v28 = vld [vmem:[#allocation2 + $0x92] sm:$0xff] }
  0x2b   : > { %v1144_v31 = vld [vmem:[#allocation2 + $0x41] sm:$0xff]  ;;  %312 = vst.msk [vmem:[#allocation2 + $0x81] sm:$0xff] %vm276_vm0, %v275_v53 }
  0x2c   : > { %v1146_v32 = vld [vmem:[#allocation2 + $0x42] sm:$0xff]  ;;  %353 = vrot.lane.b32.xlu1 %v1144_v31, %s1028_s26  ;;  %321 = vst.msk [vmem:[#allocation3] sm:$0xff] %vm276_vm0, %v313_v58 }
  0x2d   : > { %v1150_v33 = vld [vmem:[#allocation2 + $0x21] sm:$0xff]  ;;  %402 = vrot.lane.b32.xlu2 %v1146_v32, %s1029_s29  ;;  %v427_v35 = vld [vmem:[#allocation2 + $0x10] sm:$0xff] }
  0x2e   : > { %349 = vrot.lane.b32.xlu0 %v1150_v33, %s1028_s26  ;;  %v1157_v36 = vld [vmem:[#allocation2 + $0x50] sm:$0xff]  ;;  %322 = vst.msk [vmem:[#allocation3 + $0x8] sm:$0xff] %vm276_vm0, %v427_v35  ;;  %v1169_v41 = vld [vmem:[#allocation2 + $0x22] sm:$0xff] }
  0x2f   : > { %326 = vst.msk [vmem:[#allocation3 + $0x28] sm:$0xff] %vm276_vm0, %v1157_v36  ;;  %v1162_v38 = vld [vmem:[#allocation2 + $0x60] sm:$0xff]  ;;  %v476_v40 = vld [vmem:[#allocation2 + $0x11] sm:$0xff] }
  0x30   : > { %v1165_v39 = vld [vmem:[#allocation2 + $0x30] sm:$0xff]  ;;  %327 = vst.msk [vmem:[#allocation3 + $0x30] sm:$0xff] %vm276_vm0, %v1162_v38  ;;  %v1181_v44 = vld [vmem:[#allocation2 + $0x61] sm:$0xff] }
  0x31   : > { %324 = vst.msk [vmem:[#allocation3 + $0x18] sm:$0xff] %vm276_vm0, %v1165_v39  ;;  %v1177_v42 = vld [vmem:[#allocation2 + $0x70] sm:$0xff]  ;;  %v575_v45 = vld [vmem:[#allocation2 + $0x20] sm:$0xff] }
  0x32   : > { %328 = vst.msk [vmem:[#allocation3 + $0x38] sm:$0xff] %vm276_vm0, %v1177_v42  ;;  %v525_v43 = vld [vmem:[#allocation2 + $0x12] sm:$0xff]  ;;  %v1204_v48 = vld [vmem:[#allocation2 + $0x62] sm:$0xff] }
  0x33   : > { %323 = vst.msk [vmem:[#allocation3 + $0x10] sm:$0xff] %vm276_vm0, %v575_v45  ;;  %v1189_v46 = vld [vmem:[#allocation2 + $0x51] sm:$0xff]  ;;  %v577_v55 = vld [vmem:[#allocation2 + $0x40] sm:$0xff] }
  0x34   : > { %443 = vrot.lane.b32.xlu1 %v427_v35, %s1030_s30  ;;  %v1196_v47 = vld [vmem:[#allocation2 + $0x52] sm:$0xff]  ;;  %325 = vst.msk [vmem:[#allocation3 + $0x20] sm:$0xff] %vm276_vm0, %v577_v55  ;;  %v1249_v59 = vld [vmem:[#allocation2 + $0x80] sm:$0xff] }
  0x35   : > { %492 = vrot.lane.b32.xlu2 %v476_v40, %s1031_s6  ;;  %v1206_v49 = vld [vmem:[#allocation2 + $0x31] sm:$0xff]  ;;  %v1251_v60 = vld [vmem:[#allocation2 + $0x81] sm:$0xff] }
  0x36   : > { %398 = vrot.lane.b32.xlu0 %v1169_v41, %s1029_s29  ;;  %v527_v54 = vld [vmem:[#allocation2 + $0x32] sm:$0xff]  ;;  %v1271_v2 = vld [vmem:[#allocation2 + $0x82] sm:$0xff] }
  0x37   : > { %v1228_v56 = vld [vmem:[#allocation2 + $0x71] sm:$0xff] }
  0x38   : > { %v1230_v57 = vld [vmem:[#allocation2 + $0x72] sm:$0xff] }
  0x3c   : > { %451 = vrot.lane.b32.xlu1 %v1157_v36, %s1030_s30 }
  0x3d   : > { %541 = vrot.lane.b32.xlu2 %v525_v43, %s1032_s7 }
  0x3e   : > { %357 = vrot.lane.b32.xlu0 %v1181_v44, %s1028_s26 }
  0x44   : > { %500 = vrot.lane.b32.xlu1 %v1189_v46, %s1031_s6 }
  0x45   : > { %591 = vrot.lane.b32.xlu2 %v575_v45, %s1033_s8 }
  0x46   : > { %640 = vrot.lane.b32.xlu0 %v1150_v33, %s1034_s9 }
  0x4c   : > { %447 = vrot.lane.b32.xlu1 %v1165_v39, %s1030_s30 }
  0x4d   : > { %549 = vrot.lane.b32.xlu2 %v1196_v47, %s1032_s7 }
  0x4e   : > { %599 = vrot.lane.b32.xlu0 %v1162_v38, %s1033_s8 }
  0x54   : > { %406 = vrot.lane.b32.xlu1 %v1204_v48, %s1029_s29 }
  0x55   : > { %496 = vrot.lane.b32.xlu2 %v1206_v49, %s1031_s6 }
  0x56   : > { %455 = vrot.lane.b32.xlu0 %v1177_v42, %s1030_s30 }
  0x5c   : > { %689 = vrot.lane.b32.xlu1 %v1169_v41, %s1035_s10 }
  0x5d   : > { %347 = vrot.lane.b32.xlu2 %v476_v40, %s1028_s26 }
  0x5e   : > { %396 = vrot.lane.b32.xlu0 %v525_v43, %s1029_s29 }
  0x64   : > { %545 = vrot.lane.b32.xlu1 %v527_v54, %s1032_s7 }
  0x65   : > { %648 = vrot.lane.b32.xlu2 %v1181_v44, %s1034_s9 }
  0x66   : > { %697 = vrot.lane.b32.xlu0 %v1204_v48, %s1035_s10 }
  0x6c   : > { %504 = vrot.lane.b32.xlu1 %v1228_v56, %s1031_s6 }
  0x6d   : > { %595 = vrot.lane.b32.xlu2 %v577_v55, %s1033_s8 }
  0x6e   : > { %553 = vrot.lane.b32.xlu0 %v1230_v57, %s1032_s7 }
  0x74   : > { %355 = vrot.lane.b32.xlu1 %v1189_v46, %s1028_s26 }
  0x75   : > { %445 = vrot.lane.b32.xlu2 %v575_v45, %s1030_s30 }
  0x76   : > { %494 = vrot.lane.b32.xlu0 %v1150_v33, %s1031_s6 }
  0x7c   : > { %644 = vrot.lane.b32.xlu1 %v1144_v31, %s1034_s9 }
  0x7d   : > { %404 = vrot.lane.b32.xlu2 %v1196_v47, %s1029_s29 }
  0x7e   : > { %351 = vrot.lane.b32.xlu0 %v1206_v49, %s1028_s26 }
  0x84   : > { %603 = vrot.lane.b32.xlu1 %v1249_v59, %s1033_s8 }
  0x85   : > { %693 = vrot.lane.b32.xlu2 %v1146_v32, %s1035_s10 }
  0x86   : > { %652 = vrot.lane.b32.xlu0 %v1251_v60, %s1034_s9 }
  0x87   : > { %v403_v61 = vpop.permute.xlu2 %402  ;;  %v346_v62 = vpop.permute.xlu0 %345 }
  0x88   : > { %370 = vst.msk [vmem:[#allocation3] sm:$0xff] %vm369_vm3, %v346_v62 }
  0x8c   : > { %453 = vrot.lane.b32.xlu1 %v1162_v38, %s1030_s30 }
  0x8d   : > { %543 = vrot.lane.b32.xlu2 %v1169_v41, %s1032_s7 }
  0x8e   : > { %593 = vrot.lane.b32.xlu0 %v1165_v39, %s1033_s8 }
  0x8f   : > { %v493_v63 = vpop.permute.xlu2 %492 }
  0x93   : > { %v395_v0 = vpop.permute.xlu0 %394 }
  0x94   : > { %400 = vrot.lane.b32.xlu1 %v527_v54, %s1029_s29  ;;  %419 = vst.msk [vmem:[#allocation3] sm:$0xff] %vm418_vm4, %v395_v0 }
  0x95   : > { %502 = vrot.lane.b32.xlu2 %v1181_v44, %s1031_s6 }
  0x96   : > { %449 = vrot.lane.b32.xlu0 %v577_v55, %s1030_s30 }
  0x97   : > { %v542_v1 = vpop.permute.xlu2 %541 }
  0x9c   : > { %701 = vrot.lane.b32.xlu1 %v1271_v2, %s1035_s10 }
  0x9d   : > { %359 = vrot.lane.b32.xlu2 %v1228_v56, %s1028_s26 }
  0x9e   : > { %408 = vrot.lane.b32.xlu0 %v1230_v57, %s1029_s29  ;;  %v354_v3 = vpop.permute.xlu1 %353 }
  0x9f   : > { %v592_v4 = vpop.permute.xlu2 %591  ;;  %374 = vst.msk [vmem:[#allocation3 + $0x20] sm:$0xff] %vm369_vm3, %v354_v3 }
  0xa0   : > { %v350_v5 = vpop.permute.xlu0 %349  ;;  %423 = vst.msk [vmem:[#allocation3 + $0x20] sm:$0xff] %vm418_vm4, %v403_v61 }
  0xa1   : > { %372 = vst.msk [vmem:[#allocation3 + $0x10] sm:$0xff] %vm369_vm3, %v350_v5 }
  0xa4   : > { %551 = vrot.lane.b32.xlu1 %v1204_v48, %s1032_s7 }
  0xa5   : > { %642 = vrot.lane.b32.xlu2 %v1206_v49, %s1034_s9 }
  0xa6   : > { %691 = vrot.lane.b32.xlu0 %v527_v54, %s1035_s10  ;;  %v444_v7 = vpop.permute.xlu1 %443 }
  0xa7   : > { %v1290_v8 = vpop.permute.xlu2 %549  ;;  %468 = vst.msk [vmem:[#allocation3] sm:$0xff] %vm467_vm5, %v444_v7 }
  0xa8   : > { %v399_v9 = vpop.permute.xlu0 %398  ;;  %517 = vst.msk [vmem:[#allocation3] sm:$0xff] %vm516_vm6, %v493_v63 }
  0xa9   : > { %421 = vst.msk [vmem:[#allocation3 + $0x10] sm:$0xff] %vm418_vm4, %v399_v9 }
  0xaa   : > { %566 = vst.msk [vmem:[#allocation3] sm:$0xff] %vm565_vm7, %v542_v1 }
  0xab   : > { %616 = vst.msk [vmem:[#allocation3] sm:$0xff] %vm615_vm8, %v592_v4 }
  0xac   : > { %498 = vrot.lane.b32.xlu1 %v1144_v31, %s1031_s6 }
  0xad   : > { %601 = vrot.lane.b32.xlu2 %v1177_v42, %s1033_s8 }
  0xae   : > { %650 = vrot.lane.b32.xlu0 %v1228_v56, %s1034_s9  ;;  %v452_v14 = vpop.permute.xlu1 %451 }
  0xaf   : > { %v497_v15 = vpop.permute.xlu2 %496  ;;  %472 = vst.msk [vmem:[#allocation3 + $0x20] sm:$0xff] %vm467_vm5, %v452_v14 }
  0xb0   : > { %v358_v16 = vpop.permute.xlu0 %357 }
  0xb1   : > { %376 = vst.msk [vmem:[#allocation3 + $0x30] sm:$0xff] %vm369_vm3, %v358_v16 }
  0xb4   : > { %457 = vrot.lane.b32.xlu1 %v1249_v59, %s1030_s30 }
  0xb5   : > { %547 = vrot.lane.b32.xlu2 %v1146_v32, %s1032_s7  ;;  %v631_v32 = vld [vmem:[#allocation2 + $0x91] sm:$0xff] }
  0xb6   : > { %699 = vrot.lane.b32.xlu0 %v1230_v57, %s1035_s10  ;;  %v501_v21 = vpop.permute.xlu1 %500 }
  0xb7   : > { %v348_v22 = vpop.permute.xlu2 %347  ;;  %521 = vst.msk [vmem:[#allocation3 + $0x20] sm:$0xff] %vm516_vm6, %v501_v21 }
  0xb8   : > { %v641_v23 = vpop.permute.xlu0 %640  ;;  %570 = vst.msk [vmem:[#allocation3 + $0x20] sm:$0xff] %vm565_vm7, %v1290_v8 }
  0xb9   : > { %665 = vst.msk [vmem:[#allocation3] sm:$0xff] %vm664_vm9, %v641_v23 }
  0xba   : > { %371 = vst.msk [vmem:[#allocation3 + $0x8] sm:$0xff] %vm369_vm3, %v348_v22 }
  0xbc   : > { %506 = vrot.lane.b32.xlu1 %v1251_v60, %s1031_s6 }
  0xbd   : > { %597 = vrot.lane.b32.xlu2 %v1157_v36, %s1033_s8 }
  0xbe   : > { %605 = vrot.lane.b32.xlu0 %v582_v24, %s1033_s8  ;;  %v448_v25 = vpop.permute.xlu1 %447 }
  0xbf   : > { %v649_v26 = vpop.permute.xlu2 %648  ;;  %470 = vst.msk [vmem:[#allocation3 + $0x10] sm:$0xff] %vm467_vm5, %v448_v25 }
  0xc0   : > { %v600_v27 = vpop.permute.xlu0 %599  ;;  %519 = vst.msk [vmem:[#allocation3 + $0x10] sm:$0xff] %vm516_vm6, %v497_v15 }
  0xc1   : > { %620 = vst.msk [vmem:[#allocation3 + $0x20] sm:$0xff] %vm615_vm8, %v600_v27 }
  0xc2   : > { %669 = vst.msk [vmem:[#allocation3 + $0x20] sm:$0xff] %vm664_vm9, %v649_v26 }
  0xc4   : > { %555 = vrot.lane.b32.xlu1 %v1271_v2, %s1032_s7  ;;  %s1414_s7 = scalar_lea.vmem %s1461_s4, %s971_s20  ;;  %s960_s20 = sshll.u32 %s1464_s19, 1 }
  0xc5   : > { %646 = vrot.lane.b32.xlu2 %v1189_v46, %s1034_s9 }
  0xc6   : > { %703 = vrot.lane.b32.xlu0 %v680_v28, %s1035_s10  ;;  %v407_v29 = vpop.permute.xlu1 %406 }
  0xc7   : > { %v596_v30 = vpop.permute.xlu2 %595  ;;  %425 = vst.msk [vmem:[#allocation3 + $0x30] sm:$0xff] %vm418_vm4, %v407_v29 }
  0xc8   : > { %v456_v31 = vpop.permute.xlu0 %455 }
  0xc9   : > { %474 = vst.msk [vmem:[#allocation3 + $0x30] sm:$0xff] %vm467_vm5, %v456_v31 }
  0xcc   : > { %695 = vrot.lane.b32.xlu1 %v1196_v47, %s1035_s10  ;;  %s235_s10 = scalar_lea.vmem %s1462_s5, %s960_s20 }
  0xcd   : > { %654 = vrot.lane.b32.xlu2 %v631_v32, %s1034_s9 }
  0xce   : > { %v690_v33 = vpop.permute.xlu1 %689 }
  0xcf   : > { %v446_v34 = vpop.permute.xlu2 %445  ;;  %714 = vst.msk [vmem:[#allocation3] sm:$0xff] %vm713_vm10, %v690_v33 }
  0xd0   : > { %v397_v35 = vpop.permute.xlu0 %396 }
  0xd1   : > { %420 = vst.msk [vmem:[#allocation3 + $0x8] sm:$0xff] %vm418_vm4, %v397_v35 }
  0xd2   : > { %469 = vst.msk [vmem:[#allocation3 + $0x8] sm:$0xff] %vm467_vm5, %v446_v34 }
  0xd6   : > { %v546_v36 = vpop.permute.xlu1 %545  ;;  %v722_v37 = vld [vmem:[#allocation3] sm:$0xff] }
  0xd7   : > { %v405_v38 = vpop.permute.xlu2 %404  ;;  %568 = vst.msk [vmem:[#allocation3 + $0x10] sm:$0xff] %vm565_vm7, %v546_v36  ;;  %961 = vmatmul.msk.f32.vlgmr.msra.gmra.mxu0 %vm739_vm11, %v722_v37 }
  0xd8   : > { %v698_v39 = vpop.permute.xlu0 %697  ;;  %618 = vst.msk [vmem:[#allocation3 + $0x10] sm:$0xff] %vm615_vm8, %v596_v30 }
  0xd9   : > { %718 = vst.msk [vmem:[#allocation3 + $0x20] sm:$0xff] %vm713_vm10, %v698_v39 }
  0xde   : > { %v505_v40 = vpop.permute.xlu1 %504 }
  0xdf   : > { %v694_v41 = vpop.permute.xlu2 %693  ;;  %523 = vst.msk [vmem:[#allocation3 + $0x30] sm:$0xff] %vm516_vm6, %v505_v40 }
  0xe0   : > { %v554_v42 = vpop.permute.xlu0 %553  ;;  %v726_v43 = vld [vmem:[#allocation3 + $0x20] sm:$0xff] }
  0xe1   : > { %572 = vst.msk [vmem:[#allocation3 + $0x30] sm:$0xff] %vm565_vm7, %v554_v42  ;;  %965 = vmatmul.msk.f32.vlgmr.msra.gmra.mxu2 %vm739_vm11, %v726_v43 }
  0xe6   : > { %v356_v44 = vpop.permute.xlu1 %355 }
  0xe7   : > { %v544_v45 = vpop.permute.xlu2 %543  ;;  %375 = vst.msk [vmem:[#allocation3 + $0x28] sm:$0xff] %vm369_vm3, %v356_v44 }
  0xe8   : > { %v495_v46 = vpop.permute.xlu0 %494  ;;  %424 = vst.msk [vmem:[#allocation3 + $0x28] sm:$0xff] %vm418_vm4, %v405_v38 }
  0xe9   : > { %518 = vst.msk [vmem:[#allocation3 + $0x8] sm:$0xff] %vm516_vm6, %v495_v46 }
  0xea   : > { %567 = vst.msk [vmem:[#allocation3 + $0x8] sm:$0xff] %vm565_vm7, %v544_v45 }
  0xee   : > { %v645_v47 = vpop.permute.xlu1 %644 }
  0xef   : > { %v503_v48 = vpop.permute.xlu2 %502  ;;  %667 = vst.msk [vmem:[#allocation3 + $0x10] sm:$0xff] %vm664_vm9, %v645_v47 }
  0xf0   : > { %v352_v49 = vpop.permute.xlu0 %351  ;;  %716 = vst.msk [vmem:[#allocation3 + $0x10] sm:$0xff] %vm713_vm10, %v694_v41 }
  0xf1   : > { %373 = vst.msk [vmem:[#allocation3 + $0x18] sm:$0xff] %vm369_vm3, %v352_v49 }
  0xf6   : > { %v604_v50 = vpop.permute.xlu1 %603 }
  0xf7   : > { %v360_v51 = vpop.permute.xlu2 %359  ;;  %622 = vst.msk [vmem:[#allocation3 + $0x30] sm:$0xff] %vm615_vm8, %v604_v50  ;;  %v724_v53 = vld [vmem:[#allocation3 + $0x10] sm:$0xff] }
  0xf8   : > { %v653_v52 = vpop.permute.xlu0 %652  ;;  %963 = vmatmul.msk.f32.vlgmr.msra.gmra.mxu1 %vm739_vm11, %v724_v53  ;;  %377 = vst.msk [vmem:[#allocation3 + $0x38] sm:$0xff] %vm369_vm3, %v360_v51 }
  0xf9   : > { %671 = vst.msk [vmem:[#allocation3 + $0x30] sm:$0xff] %vm664_vm9, %v653_v52 }
  0xfe   : > { %v454_v54 = vpop.permute.xlu1 %453 }
  0xff   : > { %v643_v55 = vpop.permute.xlu2 %642  ;;  %473 = vst.msk [vmem:[#allocation3 + $0x28] sm:$0xff] %vm467_vm5, %v454_v54 }
 0x100   : > { %v594_v56 = vpop.permute.xlu0 %593  ;;  %522 = vst.msk [vmem:[#allocation3 + $0x28] sm:$0xff] %vm516_vm6, %v503_v48 }
 0x101   : > { %617 = vst.msk [vmem:[#allocation3 + $0x8] sm:$0xff] %vm615_vm8, %v594_v56 }
 0x102   : > { %666 = vst.msk [vmem:[#allocation3 + $0x8] sm:$0xff] %vm664_vm9, %v643_v55 }
 0x106   : > { %v401_v57 = vpop.permute.xlu1 %400 }
 0x107   : > { %v602_v58 = vpop.permute.xlu2 %601  ;;  %422 = vst.msk [vmem:[#allocation3 + $0x18] sm:$0xff] %vm418_vm4, %v401_v57 }
 0x108   : > { %v450_v59 = vpop.permute.xlu0 %449 }
 0x109   : > { %471 = vst.msk [vmem:[#allocation3 + $0x18] sm:$0xff] %vm467_vm5, %v450_v59 }
 0x10e   : > { %v702_v60 = vpop.permute.xlu1 %701 }
 0x10f   : > { %v548_v61 = vpop.permute.xlu2 %547  ;;  %720 = vst.msk [vmem:[#allocation3 + $0x30] sm:$0xff] %vm713_vm10, %v702_v60 }
 0x110   : > { %v409_v62 = vpop.permute.xlu0 %408 }
 0x111   : > { %426 = vst.msk [vmem:[#allocation3 + $0x38] sm:$0xff] %vm418_vm4, %v409_v62 }
 0x116   : > { %v552_v63 = vpop.permute.xlu1 %551  ;;  %v728_v0 = vld [vmem:[#allocation3 + $0x30] sm:$0xff] }
 0x117   : > { %v598_v1 = vpop.permute.xlu2 %597  ;;  %571 = vst.msk [vmem:[#allocation3 + $0x28] sm:$0xff] %vm565_vm7, %v552_v63  ;;  %967 = vmatmul.msk.f32.vlgmr.msra.gmra.mxu3 %vm739_vm11, %v728_v0 }
 0x118   : > { %v692_v2 = vpop.permute.xlu0 %691  ;;  %621 = vst.msk [vmem:[#allocation3 + $0x28] sm:$0xff] %vm615_vm8, %v602_v58 }
 0x119   : > { %715 = vst.msk [vmem:[#allocation3 + $0x8] sm:$0xff] %vm713_vm10, %v692_v2 }
 0x11e   : > { %v499_v3 = vpop.permute.xlu1 %498 }
 0x11f   : > { %520 = vst.msk [vmem:[#allocation3 + $0x18] sm:$0xff] %vm516_vm6, %v499_v3  ;;  %v647_v6 = vpop.permute.xlu2 %646 }
 0x120   : > { %v723_v4 = vld [vmem:[#allocation3 + $0x8] sm:$0xff]  ;;  %v651_v5 = vpop.permute.xlu0 %650  ;;  %569 = vst.msk [vmem:[#allocation3 + $0x18] sm:$0xff] %vm565_vm7, %v548_v61 }
 0x121   : > { %962 = vmatmul.msk.f32.gmra.mxu0 %vm739_vm11, %v723_v4  ;;  %670 = vst.msk [vmem:[#allocation3 + $0x28] sm:$0xff] %vm664_vm9, %v651_v5 }
 0x122   : > { %619 = vst.msk [vmem:[#allocation3 + $0x18] sm:$0xff] %vm615_vm8, %v598_v1 }
 0x123   : > { %668 = vst.msk [vmem:[#allocation3 + $0x18] sm:$0xff] %vm664_vm9, %v647_v6 }
 0x126   : > { %v458_v7 = vpop.permute.xlu1 %457 }
 0x127   : > { %475 = vst.msk [vmem:[#allocation3 + $0x38] sm:$0xff] %vm467_vm5, %v458_v7  ;;  %v655_v13 = vpop.permute.xlu2 %654 }
 0x128   : > { %v700_v8 = vpop.permute.xlu0 %699 }
 0x129   : > { %719 = vst.msk [vmem:[#allocation3 + $0x28] sm:$0xff] %vm713_vm10, %v700_v8 }
 0x12e   : > { %v507_v9 = vpop.permute.xlu1 %506 }
 0x12f   : > { %524 = vst.msk [vmem:[#allocation3 + $0x38] sm:$0xff] %vm516_vm6, %v507_v9 }
 0x130   : > { %v606_v10 = vpop.permute.xlu0 %605  ;;  %v727_v11 = vld [vmem:[#allocation3 + $0x28] sm:$0xff] }
 0x131   : > { %966 = vmatmul.msk.f32.gmra.mxu2 %vm739_vm11, %v727_v11 }
 0x136   : > { %v556_v12 = vpop.permute.xlu1 %555 }
 0x137   : > { %573 = vst.msk [vmem:[#allocation3 + $0x38] sm:$0xff] %vm565_vm7, %v556_v12 }
 0x138   : > { %v704_v14 = vpop.permute.xlu0 %703  ;;  %623 = vst.msk [vmem:[#allocation3 + $0x38] sm:$0xff] %vm615_vm8, %v606_v10 }
 0x139   : > { %672 = vst.msk [vmem:[#allocation3 + $0x38] sm:$0xff] %vm664_vm9, %v655_v13 }
 0x13a   : > { %721 = vst.msk [vmem:[#allocation3 + $0x38] sm:$0xff] %vm713_vm10, %v704_v14 }
 0x13e   : > { %v696_v15 = vpop.permute.xlu1 %695 }
 0x13f   : > { %717 = vst.msk [vmem:[#allocation3 + $0x18] sm:$0xff] %vm713_vm10, %v696_v15 }
 0x141   : > { %v729_v16 = vld [vmem:[#allocation3 + $0x38] sm:$0xff] }
 0x142   : > { %968 = vmatmul.msk.f32.gmra.mxu3 %vm739_vm11, %v729_v16 }
 0x146   : > { %v725_v17 = vld [vmem:[#allocation3 + $0x18] sm:$0xff] }
 0x147   : > { %964 = vmatmul.msk.f32.gmra.mxu1 %vm739_vm11, %v725_v17 }
 0x154   : > { %v781_v18 = vpop.f32.mrf.mxu0 }
 0x155   : > { %805 = vst.msk [vmem:[%s1414_s7] sm:$0xff] %vm276_vm0, %v781_v18  ;;  %v835_v25 = vmul.f32 %v781_v18, %v781_v18  ;;  %v813_v27 = vsel %vm276_vm0, %v781_v18, 0.0 }
 0x157   : > { %v843_v30 = vsel %vm276_vm0, %v835_v25, 0.0 }
 0x164   : > { %v793_v19 = vpop.f32.mrf.mxu2 }
 0x165   : > { %809 = vst.msk [vmem:[%s1414_s7 + $0x20] sm:$0xff] %vm276_vm0, %v793_v19  ;;  %v839_v36 = vmul.f32 %v793_v19, %v793_v19  ;;  %v820_v43 = vsel %vm276_vm0, %v793_v19, 0.0 }
 0x167   : > { %v850_v48 = vsel %vm276_vm0, %v839_v36, 0.0 }
 0x175   : > { %v787_v20 = vpop.f32.mrf.mxu1 }
 0x176   : > { %807 = vst.msk [vmem:[%s1414_s7 + $0x10] sm:$0xff] %vm276_vm0, %v787_v20  ;;  %v837_v31 = vmul.f32 %v787_v20, %v787_v20  ;;  %v816_v33 = vsel %vm276_vm0, %v787_v20, 0.0 }
 0x178   : > { %v846_v37 = vsel %vm276_vm0, %v837_v31, 0.0 }
 0x19a   : > { %v799_v21 = vpop.f32.mrf.mxu3 }
 0x19b   : > { %811 = vst.msk [vmem:[%s1414_s7 + $0x30] sm:$0xff] %vm276_vm0, %v799_v21  ;;  %v841_v49 = vmul.f32 %v799_v21, %v799_v21  ;;  %v824_v54 = vsel %vm276_vm0, %v799_v21, 0.0 }
 0x19d   : > { %v854_v59 = vsel %vm276_vm0, %v841_v49, 0.0 }
 0x19e   : > { %v784_v22 = vpop.f32.mrf.mxu0 }
 0x19f   : > { %806 = vst.msk [vmem:[%s1414_s7 + $0x8] sm:$0xff] %vm276_vm0, %v784_v22  ;;  %v836_v24 = vmul.f32 %v784_v22, %v784_v22  ;;  %v814_v26 = vsel %vm276_vm0, %v784_v22, 0.0 }
 0x1a0   : > { %v815_v29 = vadd.f32 %v814_v26, %v813_v27 }
 0x1a1   : > { %v844_v28 = vsel %vm276_vm0, %v836_v24, 0.0 }
 0x1a2   : > { %v845_v32 = vadd.f32 %v844_v28, %v843_v30  ;;  %v817_v35 = vadd.f32 %v816_v33, %v815_v29 }
 0x1a4   : > { %v847_v42 = vadd.f32 %v846_v37, %v845_v32 }
 0x1b4   : > { %v796_v23 = vpop.f32.mrf.mxu2 }
 0x1b5   : > { %810 = vst.msk [vmem:[%s1414_s7 + $0x28] sm:$0xff] %vm276_vm0, %v796_v23  ;;  %v840_v44 = vmul.f32 %v796_v23, %v796_v23  ;;  %v822_v50 = vsel %vm276_vm0, %v796_v23, 0.0 }
 0x1b7   : > { %v852_v55 = vsel %vm276_vm0, %v840_v44, 0.0 }
 0x1c4   : > { %v790_v34 = vpop.f32.mrf.mxu1 }
 0x1c5   : > { %808 = vst.msk [vmem:[%s1414_s7 + $0x18] sm:$0xff] %vm276_vm0, %v790_v34  ;;  %v818_v38 = vsel %vm276_vm0, %v790_v34, 0.0  ;;  %v838_v39 = vmul.f32 %v790_v34, %v790_v34  ;;  %v802_v40 = vpop.f32.mrf.mxu3 }
 0x1c6   : > { %v819_v41 = vadd.f32 %v818_v38, %v817_v35  ;;  %812 = vst.msk [vmem:[%s1414_s7 + $0x38] sm:$0xff] %vm276_vm0, %v802_v40  ;;  %v842_v51 = vmul.f32 %v802_v40, %v802_v40  ;;  %v826_v56 = vsel %vm276_vm0, %v802_v40, 0.0 }
 0x1c7   : > { %v848_v45 = vsel %vm276_vm0, %v838_v39, 0.0 }
 0x1c8   : > { %v821_v46 = vadd.f32 %v820_v43, %v819_v41  ;;  %v849_v47 = vadd.f32 %v848_v45, %v847_v42  ;;  %v856_v60 = vsel %vm276_vm0, %v842_v51, 0.0 }
 0x1ca   : > { %v851_v52 = vadd.f32 %v850_v48, %v849_v47  ;;  %v823_v53 = vadd.f32 %v822_v50, %v821_v46 }
 0x1cc   : > { %v825_v57 = vadd.f32 %v824_v54, %v823_v53  ;;  %v853_v58 = vadd.f32 %v852_v55, %v851_v52 }
 0x1ce   : > { %v827_v61 = vadd.f32 %v826_v56, %v825_v57  ;;  %v855_v62 = vadd.f32 %v854_v59, %v853_v58 }
 0x1d0   : > { %v828_v63 = vrot.slane %v827_v61, 4  ;;  %v857_v0 = vadd.f32 %v856_v60, %v855_v62 }
 0x1d2   : > { %v829_v1 = vadd.f32 %v828_v63, %v827_v61  ;;  %v858_v2 = vrot.slane %v857_v0, 4 }
 0x1d4   : > { %v830_v3 = vrot.slane %v829_v1, 2  ;;  %v859_v4 = vadd.f32 %v858_v2, %v857_v0 }
 0x1d6   : > { %v831_v5 = vadd.f32 %v830_v3, %v829_v1  ;;  %v860_v6 = vrot.slane %v859_v4, 2 }
 0x1d8   : > { %v832_v7 = vrot.slane %v831_v5, 1  ;;  %v861_v8 = vadd.f32 %v860_v6, %v859_v4 }
 0x1da   : > { %v833_v9 = vadd.f32 %v832_v7, %v831_v5  ;;  %v862_v10 = vrot.slane %v861_v8, 1 }
 0x1dc   : > { %834 = vst.msk [vmem:[%s235_s10] sm:$0x1] %vm283_vm2, %v833_v9  ;;  %v863_v11 = vadd.f32 %v862_v10, %v861_v8 }
 0x1de   : > { %864 = vst.msk [vmem:[%s235_s10 + $0x1] sm:$0x1] %vm283_vm2, %v863_v11 }
 0x1df PF: > { %s16_s18 = sadd.s32 1, %s1025_s18  }
 0x1e0   : > { %p13_p4 = scmp.ge.s32.totalorder %s16_s18, 4  }
 0x1e2   :  { %15 = sbr.rel (!%p13_p4) target bundleno = 1 (0x1), region = 81 }

// kernel: down_forward.2
= control target key start
LH: loop header
LB: loop body
LE: loop exit
PB: predicated region body
PF: predicated region fallthrough
CT: control target
= control target key end

     0   :  { %s1017_s12 = smov 0   ;;  %s1386_s0 = inlined_call_operand.vmem [shape: f32[2,8,2,8,8], index: 0, kind: input, shape index: {}]   ;;  %s1387_s1 = inlined_call_operand.vmem [shape: f32[36,8], index: 1, kind: input, shape index: {}]   ;;  %s1388_s2 = inlined_call_operand.vmem [shape: f32[2,8,8,8], index: 2, kind: output, shape index: {0}]   ;;  %s1389_s3 = inlined_call_operand.vmem [shape: f32[2,2,8], index: 3, kind: output, shape index: {1}]  }
   0x1 LB: > { %s923_s13 = sadd.s32 4294967295, %s985_s12   ;;  %p927_p0 = scmp.ge.s32.totalorder %s985_s12, 1  ;;  %s985_s12 = sphi %s1017_s12, %s14_s12  }
   0x2   : > { %p140_p1 = scmp.lt.s32.totalorder %s985_s12, 3 }
   0x4   : > { %p141_p2 = pnand %p927_p0, %p140_p1 }
   0x5   : > { %p168_p3 = scmp.lt.s32.totalorder (!%p141_p2), %s923_s13, 1  ;;  %s988_s18 = smov (!%p141_p2), 124  }
   0x6   : > { %144 = sbr.rel (%p141_p2) target bundleno = 585 (0x249), region = 28  ;;  %s989_s19 = smov (!%p141_p2), 8  }
   0x7   : > { %s990_s20 = smov (!%p141_p2), 4   ;;  %s991_s21 = smov (!%p141_p2), 12  }
   0x8   : > { %s992_s22 = smov (!%p141_p2), 16   ;;  %s993_s23 = smov (!%p141_p2), 20  }
   0x9   : > { %s994_s24 = smov (!%p141_p2), 28   ;;  %s995_s25 = smov (!%p141_p2), 24  }
   0xa   : > { %s996_s26 = smov (!%p141_p2), 32  }
   0xb   : > { %vm246_vm0 = vcmask 31744   ;;  %vm248_vm1 = vcmask 25600   ;;  %vm253_vm2 = vcmask 24576   ;;  %v987_v0 = vmov 0.0   ;;  %s1391_s13 = smov (!%p168_p3, %s923_s13), 1 }
   0xc   : > { %247 = vst.msk [vmem:[#allocation2] sm:$0xff] %vm246_vm0, %v987_v0  ;;  %s944_s14 = sshll.u32 %s1391_s13, 7  ;;  %vm339_vm3 = vcmask 64544   ;;  %vm388_vm4 = vcmask 97344   ;;  %vm437_vm5 = vcmask 130144   ;;  %vm486_vm6 = vcmask 162944  }
   0xd   : > { %249 = vst.msk [vmem:[#allocation2 + $0x8] sm:$0x3] %vm248_vm1, %v987_v0  ;;  %s1034_s17 = scalar_lea.vmem %s1386_s0, %s944_s14  ;;  %vm730_vm7 = vcmask 1043456   ;;  %vm535_vm8 = vcmask 195744   ;;  %vm585_vm9 = vcmask 228544   ;;  %vm634_vm10 = vcmask 261344  }
   0xe   : > { %264 = vst.msk [vmem:[#allocation2 + $0x9] sm:$0x1] %vm253_vm2, %v987_v0  ;;  %v182_v1 = vld [vmem:[%s1034_s17] sm:$0xff]  ;;  %v183_v2 = vld [vmem:[%s1034_s17 + $0x8] sm:$0xff]  ;;  %v184_v3 = vld [vmem:[%s1034_s17 + $0x10] sm:$0xff]  ;;  %vm683_vm11 = vcmask 294144  }
   0xf   : > { %251 = vst.msk [vmem:[#allocation2 + $0x90] sm:$0xff] %vm246_vm0, %v987_v0  ;;  %v1040_v4 = vmax.f32 %v182_v1, %v183_v2  ;;  %v185_v5 = vld [vmem:[%s1034_s17 + $0x18] sm:$0xff]  ;;  %v186_v7 = vld [vmem:[%s1034_s17 + $0x20] sm:$0xff]  ;;  %v187_v8 = vld [vmem:[%s1034_s17 + $0x28] sm:$0xff]  ;;  %vm705_vm12 = vcmask 293888   ;;  %s945_s10 = sshll.u32 %s1391_s13, 6 }
  0x10   : > { %252 = vst.msk [vmem:[#allocation2 + $0x98] sm:$0x3] %vm248_vm1, %v987_v0  ;;  %v1044_v6 = vmax.f32 %v184_v3, %v185_v5  ;;  %v188_v9 = vld [vmem:[%s1034_s17 + $0x30] sm:$0xff]  ;;  %v189_v10 = vld [vmem:[%s1034_s17 + $0x38] sm:$0xff]  ;;  %v200_v11 = vmax.f32 %v186_v7, %v187_v8  ;;  %v190_v12 = vld [vmem:[%s1034_s17 + $0x40] sm:$0xff]  ;;  %s1345_s15 = scalar_lea.vmem %s1388_s2, %s945_s10  ;;  %vm775_vm13 = vcmask 64512  }
  0x11   : > { %254 = vst.msk [vmem:[#allocation2] sm:$0x1] %vm253_vm2, %v987_v0  ;;  %214 = vrot.lane.b32.xlu0 %v1040_v4, %s988_s18  ;;  %v191_v13 = vld [vmem:[%s1034_s17 + $0x48] sm:$0xff]  ;;  %v201_v14 = vmax.f32 %v188_v9, %v189_v10  ;;  %v192_v15 = vld [vmem:[%s1034_s17 + $0x50] sm:$0xff]  ;;  %v193_v16 = vld [vmem:[%s1034_s17 + $0x58] sm:$0xff]  ;;  %s932_s16 = sshll.u32 %s1391_s13, 1 }
  0x12   : > { %255 = vst.msk [vmem:[#allocation2 + $0x10] sm:$0x1] %vm253_vm2, %v987_v0  ;;  %216 = vrot.lane.b32.xlu1 %v1044_v6, %s988_s18  ;;  %218 = vrot.lane.b32.xlu2 %v200_v11, %s988_s18  ;;  %v202_v17 = vmax.f32 %v190_v12, %v191_v13  ;;  %v203_v18 = vmax.f32 %v192_v15, %v193_v16  ;;  %v194_v19 = vld [vmem:[%s1034_s17 + $0x60] sm:$0xff]  ;;  %v195_v20 = vld [vmem:[%s1034_s17 + $0x68] sm:$0xff]  ;;  %vm805_vm14 = vcmask 57344  }
  0x13   : > { %256 = vst.msk [vmem:[#allocation2 + $0x20] sm:$0x1] %vm253_vm2, %v987_v0  ;;  %v196_v21 = vld [vmem:[%s1034_s17 + $0x70] sm:$0xff]  ;;  %v197_v22 = vld [vmem:[%s1034_s17 + $0x78] sm:$0xff]  ;;  %v204_v23 = vmax.f32 %v194_v19, %v195_v20  ;;  %v704_v13 = vld [vmem:[%s1387_s1 + $0x20] sm:$0xf] }
  0x14   : > { %257 = vst.msk [vmem:[#allocation2 + $0x30] sm:$0x1] %vm253_vm2, %v987_v0  ;;  %v1080_v24 = vmax.f32 %v196_v21, %v197_v22  ;;  %v299_v26 = vld [vmem:[#allocation2 + $0x1] sm:$0xff]  ;;  %933 = vmatpush.msk.msra.mxu0 %vm730_vm7, %v704_v13  ;;  %947 = vmatpush.msk.msra.mxu2 %vm730_vm7, %v704_v13 }
  0x15   : > { %258 = vst.msk [vmem:[#allocation2 + $0x40] sm:$0x1] %vm253_vm2, %v987_v0  ;;  %v348_v25 = vld [vmem:[#allocation2 + $0x2] sm:$0xff]  ;;  %946 = vmatpush.msk.msra.mxu1 %vm730_vm7, %v704_v13  ;;  %948 = vmatpush.msk.msra.mxu3 %vm730_vm7, %v704_v13 }
  0x16   : > { %259 = vst.msk [vmem:[#allocation2 + $0x50] sm:$0x1] %vm253_vm2, %v987_v0  ;;  %v701_v19 = vld [vmem:[%s1387_s1 + $0x8] sm:$0xff]  ;;  %v700_v20 = vld [vmem:[%s1387_s1] sm:$0xff] }
  0x17   : > { %260 = vst.msk [vmem:[#allocation2 + $0x60] sm:$0x1] %vm253_vm2, %v987_v0 }
  0x18   : > { %261 = vst.msk [vmem:[#allocation2 + $0x70] sm:$0x1] %vm253_vm2, %v987_v0  ;;  %v283_v61 = vld [vmem:[#allocation2] sm:$0xff] }
  0x19   : > { %262 = vst.msk [vmem:[#allocation2 + $0x80] sm:$0x1] %vm253_vm2, %v987_v0  ;;  %220 = vrot.lane.b32.xlu0 %v201_v14, %s988_s18 }
  0x1a   : > { %265 = vst.msk [vmem:[#allocation2 + $0x19] sm:$0x1] %vm253_vm2, %v987_v0  ;;  %222 = vrot.lane.b32.xlu1 %v202_v17, %s988_s18  ;;  %224 = vrot.lane.b32.xlu2 %v203_v18, %s988_s18 }
  0x1b   : > { %266 = vst.msk [vmem:[#allocation2 + $0x29] sm:$0x1] %vm253_vm2, %v987_v0 }
  0x1c   : > { %267 = vst.msk [vmem:[#allocation2 + $0x39] sm:$0x1] %vm253_vm2, %v987_v0 }
  0x1d   : > { %268 = vst.msk [vmem:[#allocation2 + $0x49] sm:$0x1] %vm253_vm2, %v987_v0 }
  0x1e   : > { %269 = vst.msk [vmem:[#allocation2 + $0x59] sm:$0x1] %vm253_vm2, %v987_v0 }
  0x1f   : > { %270 = vst.msk [vmem:[#allocation2 + $0x69] sm:$0x1] %vm253_vm2, %v987_v0 }
  0x20   : > { %271 = vst.msk [vmem:[#allocation2 + $0x79] sm:$0x1] %vm253_vm2, %v987_v0 }
  0x21   : > { %272 = vst.msk [vmem:[#allocation2 + $0x89] sm:$0x1] %vm253_vm2, %v987_v0  ;;  %226 = vrot.lane.b32.xlu0 %v204_v23, %s988_s18 }
  0x22   : > { %263 = vst.msk [vmem:[#allocation2 + $0x90] sm:$0x1] %vm253_vm2, %v987_v0  ;;  %228 = vrot.lane.b32.xlu1 %v1080_v24, %s988_s18  ;;  %315 = vrot.lane.b32.xlu2 %v299_v26, %s990_s20 }
  0x23   : > { %273 = vst.msk [vmem:[#allocation2 + $0x99] sm:$0x1] %vm253_vm2, %v987_v0 }
  0x24   : > { %291 = vst.msk [vmem:[#allocation3] sm:$0xff] %vm246_vm0, %v283_v61 }
  0x29   : > { %364 = vrot.lane.b32.xlu0 %v348_v25, %s989_s19 }
  0x6c   : > { %v219_v27 = vpop.permute.xlu2 %218 }
  0x6d   : > { %v240_v28 = vmax.f32 %v200_v11, %v219_v27  ;;  %v552_v27 = vld [vmem:[#allocation2 + $0x90] sm:$0xff] }
  0x6f   : > { %277 = vst.msk [vmem:[#allocation2 + $0x31] sm:$0xff] %vm246_vm0, %v240_v28 }
  0x74   : > { %v225_v29 = vpop.permute.xlu2 %224 }
  0x75   : > { %v243_v30 = vmax.f32 %v203_v18, %v225_v29  ;;  %v702_v18 = vld [vmem:[%s1387_s1 + $0x10] sm:$0xff] }
  0x76   : > { %v1107_v42 = vld [vmem:[#allocation2 + $0x30] sm:$0xff] }
  0x77   : > { %280 = vst.msk [vmem:[#allocation2 + $0x61] sm:$0xff] %vm246_vm0, %v243_v30  ;;  %v448_v60 = vld [vmem:[#allocation2 + $0x31] sm:$0xff] }
  0x78   : > { %294 = vst.msk [vmem:[#allocation3 + $0x18] sm:$0xff] %vm246_vm0, %v1107_v42  ;;  %v497_v63 = vld [vmem:[#allocation2 + $0x32] sm:$0xff] }
  0x7c   : > { %v316_v62 = vpop.permute.xlu2 %315 }
  0x7d   : > { %340 = vst.msk [vmem:[#allocation3] sm:$0xff] %vm339_vm3, %v316_v62 }
  0x7e   : > { %v1101_v41 = vld [vmem:[#allocation2 + $0x60] sm:$0xff] }
  0x7f   : > { %297 = vst.msk [vmem:[#allocation3 + $0x30] sm:$0xff] %vm246_vm0, %v1101_v41  ;;  %v1144_v53 = vld [vmem:[#allocation2 + $0x61] sm:$0xff] }
  0x80   : > { %v354_v56 = vld [vmem:[#allocation2 + $0x62] sm:$0xff] }
  0x83   : > { %v215_v31 = vpop.permute.xlu0 %214 }
  0x84   : > { %v238_v32 = vmax.f32 %v1040_v4, %v215_v31  ;;  %v217_v33 = vpop.permute.xlu1 %216  ;;  %v650_v31 = vld [vmem:[#allocation2 + $0x92] sm:$0xff] }
  0x85   : > { %v239_v34 = vmax.f32 %v1044_v6, %v217_v33 }
  0x86   : > { %275 = vst.msk [vmem:[#allocation2 + $0x11] sm:$0xff] %vm246_vm0, %v238_v32 }
  0x87   : > { %276 = vst.msk [vmem:[#allocation2 + $0x21] sm:$0xff] %vm246_vm0, %v239_v34 }
  0x8b   : > { %v221_v35 = vpop.permute.xlu0 %220 }
  0x8c   : > { %v241_v36 = vmax.f32 %v201_v14, %v221_v35  ;;  %v223_v37 = vpop.permute.xlu1 %222  ;;  %v601_v35 = vld [vmem:[#allocation2 + $0x91] sm:$0xff] }
  0x8d   : > { %v397_v38 = vld [vmem:[#allocation2 + $0x10] sm:$0xff]  ;;  %v242_v39 = vmax.f32 %v202_v17, %v223_v37  ;;  %v703_v17 = vld [vmem:[%s1387_s1 + $0x18] sm:$0xff] }
  0x8e   : > { %278 = vst.msk [vmem:[#allocation2 + $0x41] sm:$0xff] %vm246_vm0, %v241_v36  ;;  %413 = vrot.lane.b32.xlu2 %v397_v38, %s991_s21  ;;  %v1099_v40 = vld [vmem:[#allocation2 + $0x20] sm:$0xff]  ;;  %v446_v51 = vld [vmem:[#allocation2 + $0x11] sm:$0xff]  ;;  %746 = vmatpush.msra.mxu0 %v703_v17 }
  0x8f   : > { %279 = vst.msk [vmem:[#allocation2 + $0x51] sm:$0xff] %vm246_vm0, %v242_v39  ;;  %v1110_v43 = vld [vmem:[#allocation2 + $0x21] sm:$0xff]  ;;  %v495_v55 = vld [vmem:[#allocation2 + $0x12] sm:$0xff]  ;;  %950 = vmatpush.msra.mxu2 %v703_v17  ;;  %949 = vmatpush.msra.mxu1 %v703_v17 }
  0x90   : > { %293 = vst.msk [vmem:[#allocation3 + $0x10] sm:$0xff] %vm246_vm0, %v1099_v40  ;;  %v1133_v50 = vld [vmem:[#allocation2 + $0x22] sm:$0xff]  ;;  %951 = vmatpush.msra.mxu3 %v703_v17  ;;  %747 = vmatpush.msra.mxu0 %v702_v18 }
  0x91   : > { %292 = vst.msk [vmem:[#allocation3 + $0x8] sm:$0xff] %vm246_vm0, %v397_v38  ;;  %953 = vmatpush.msra.mxu2 %v702_v18  ;;  %952 = vmatpush.msra.mxu1 %v702_v18 }
  0x92   : > { %748 = vmatpush.msra.mxu0 %v701_v19  ;;  %954 = vmatpush.msra.mxu3 %v702_v18 }
  0x93   : > { %v227_v44 = vpop.permute.xlu0 %226  ;;  %956 = vmatpush.msra.mxu2 %v701_v19  ;;  %955 = vmatpush.msra.mxu1 %v701_v19 }
  0x94   : > { %v244_v45 = vmax.f32 %v204_v23, %v227_v44  ;;  %v229_v58 = vpop.permute.xlu1 %228  ;;  %749 = vmatpush.msra.mxu0 %v700_v20  ;;  %957 = vmatpush.msra.mxu3 %v701_v19 }
  0x95   : > { %v1114_v46 = vld [vmem:[#allocation2 + $0x42] sm:$0xff]  ;;  %v245_v59 = vmax.f32 %v1080_v24, %v229_v58  ;;  %959 = vmatpush.msra.mxu2 %v700_v20  ;;  %958 = vmatpush.msra.mxu1 %v700_v20 }
  0x96   : > { %v1116_v47 = vld [vmem:[#allocation2 + $0x41] sm:$0xff]  ;;  %319 = vrot.lane.b32.xlu2 %v1110_v43, %s990_s20  ;;  %372 = vrot.lane.b32.xlu0 %v1114_v46, %s989_s19  ;;  %v1122_v48 = vld [vmem:[#allocation2 + $0x50] sm:$0xff]  ;;  %281 = vst.msk [vmem:[#allocation2 + $0x71] sm:$0xff] %vm246_vm0, %v244_v45 }
  0x97   : > { %323 = vrot.lane.b32.xlu1 %v1116_v47, %s990_s20  ;;  %v1127_v49 = vld [vmem:[#allocation2 + $0x40] sm:$0xff]  ;;  %296 = vst.msk [vmem:[#allocation3 + $0x28] sm:$0xff] %vm246_vm0, %v1122_v48  ;;  %v1146_v54 = vld [vmem:[#allocation2 + $0x51] sm:$0xff]  ;;  %960 = vmatpush.msra.mxu3 %v700_v20 }
  0x98   : > { %295 = vst.msk [vmem:[#allocation3 + $0x20] sm:$0xff] %vm246_vm0, %v1127_v49  ;;  %v1162_v57 = vld [vmem:[#allocation2 + $0x52] sm:$0xff] }
  0x99   : > { %282 = vst.msk [vmem:[#allocation2 + $0x81] sm:$0xff] %vm246_vm0, %v245_v59 }
  0x9b   : > { %v365_v0 = vpop.permute.xlu0 %364 }
  0x9c   : > { %389 = vst.msk [vmem:[#allocation3] sm:$0xff] %vm388_vm4, %v365_v0 }
  0x9d   : > { %v1139_v52 = vld [vmem:[#allocation2 + $0x70] sm:$0xff] }
  0x9e   : > { %368 = vrot.lane.b32.xlu2 %v1133_v50, %s989_s19  ;;  %421 = vrot.lane.b32.xlu0 %v1122_v48, %s991_s21  ;;  %298 = vst.msk [vmem:[#allocation3 + $0x38] sm:$0xff] %vm246_vm0, %v1139_v52  ;;  %v1179_v1 = vld [vmem:[#allocation2 + $0x71] sm:$0xff] }
  0x9f   : > { %462 = vrot.lane.b32.xlu1 %v446_v51, %s992_s22  ;;  %v1186_v2 = vld [vmem:[#allocation2 + $0x72] sm:$0xff] }
  0xa0   : > { %v551_v3 = vld [vmem:[#allocation2 + $0x80] sm:$0xff] }
  0xa1   : > { %v1205_v5 = vld [vmem:[#allocation2 + $0x81] sm:$0xff] }
  0xa2   : > { %v1220_v8 = vld [vmem:[#allocation2 + $0x82] sm:$0xff] }
  0xa6   : > { %327 = vrot.lane.b32.xlu2 %v1144_v53, %s990_s20  ;;  %470 = vrot.lane.b32.xlu0 %v1146_v54, %s992_s22 }
  0xa7   : > { %511 = vrot.lane.b32.xlu1 %v495_v55, %s993_s23 }
  0xae   : > { %610 = vrot.lane.b32.xlu2 %v1110_v43, %s994_s24  ;;  %417 = vrot.lane.b32.xlu0 %v1107_v42, %s991_s21 }
  0xaf   : > { %561 = vrot.lane.b32.xlu1 %v1099_v40, %s995_s25 }
  0xb6   : > { %569 = vrot.lane.b32.xlu2 %v1101_v41, %s995_s25  ;;  %376 = vrot.lane.b32.xlu0 %v354_v56, %s989_s19 }
  0xb7   : > { %519 = vrot.lane.b32.xlu1 %v1162_v57, %s993_s23 }
  0xbe   : > { %659 = vrot.lane.b32.xlu0 %v1133_v50, %s996_s26  ;;  %425 = vrot.lane.b32.xlu2 %v1139_v52, %s991_s21 }
  0xbf   : > { %466 = vrot.lane.b32.xlu1 %v448_v60, %s992_s22 }
  0xc6   : > { %515 = vrot.lane.b32.xlu0 %v497_v63, %s993_s23  ;;  %366 = vrot.lane.b32.xlu2 %v495_v55, %s989_s19 }
  0xc7   : > { %317 = vrot.lane.b32.xlu1 %v446_v51, %s990_s20 }
  0xce   : > { %474 = vrot.lane.b32.xlu0 %v1179_v1, %s992_s22  ;;  %667 = vrot.lane.b32.xlu2 %v354_v56, %s996_s26 }
  0xcf   : > { %618 = vrot.lane.b32.xlu1 %v1144_v53, %s994_s24 }
  0xd6   : > { %325 = vrot.lane.b32.xlu0 %v1146_v54, %s990_s20  ;;  %523 = vrot.lane.b32.xlu2 %v1186_v2, %s993_s23 }
  0xd7   : > { %565 = vrot.lane.b32.xlu1 %v1127_v49, %s995_s25 }
  0xde   : > { %614 = vrot.lane.b32.xlu0 %v1116_v47, %s994_s24  ;;  %464 = vrot.lane.b32.xlu2 %v1110_v43, %s992_s22 }
  0xdf   : > { %415 = vrot.lane.b32.xlu1 %v1099_v40, %s991_s21 }
  0xe6   : > { %573 = vrot.lane.b32.xlu0 %v551_v3, %s995_s25  ;;  %321 = vrot.lane.b32.xlu2 %v448_v60, %s990_s20 }
  0xe7   : > { %374 = vrot.lane.b32.xlu1 %v1162_v57, %s989_s19 }
  0xe8   : > { %v414_v4 = vpop.permute.xlu2 %413 }
  0xe9   : > { %438 = vst.msk [vmem:[#allocation3] sm:$0xff] %vm437_vm5, %v414_v4 }
  0xee   : > { %423 = vrot.lane.b32.xlu0 %v1101_v41, %s991_s21  ;;  %622 = vrot.lane.b32.xlu2 %v1205_v5, %s994_s24 }
  0xef   : > { %663 = vrot.lane.b32.xlu1 %v1114_v46, %s996_s26 }
  0xf0   : > { %v320_v6 = vpop.permute.xlu2 %319 }
  0xf1   : > { %342 = vst.msk [vmem:[#allocation3 + $0x10] sm:$0xff] %vm339_vm3, %v320_v6 }
  0xf6   : > { %370 = vrot.lane.b32.xlu0 %v497_v63, %s989_s19  ;;  %563 = vrot.lane.b32.xlu2 %v1107_v42, %s995_s25 }
  0xf7   : > { %513 = vrot.lane.b32.xlu1 %v1133_v50, %s993_s23 }
  0xf8   : > { %v369_v7 = vpop.permute.xlu2 %368 }
  0xf9   : > { %391 = vst.msk [vmem:[#allocation3 + $0x10] sm:$0xff] %vm388_vm4, %v369_v7 }
  0xfe   : > { %671 = vrot.lane.b32.xlu0 %v1220_v8, %s996_s26  ;;  %419 = vrot.lane.b32.xlu2 %v1127_v49, %s991_s21 }
  0xff   : > { %472 = vrot.lane.b32.xlu1 %v1144_v53, %s992_s22 }
 0x100   : > { %v328_v9 = vpop.permute.xlu2 %327 }
 0x101   : > { %346 = vst.msk [vmem:[#allocation3 + $0x30] sm:$0xff] %vm339_vm3, %v328_v9 }
 0x106   : > { %521 = vrot.lane.b32.xlu0 %v354_v56, %s993_s23  ;;  %378 = vrot.lane.b32.xlu2 %v1186_v2, %s989_s19  ;;  %s181_s19 = scalar_lea.vmem %s1389_s3, %s932_s16 }
 0x107   : > { %329 = vrot.lane.b32.xlu1 %v1179_v1, %s990_s20 }
 0x108   : > { %v611_v10 = vpop.permute.xlu2 %610  ;;  %v373_v11 = vpop.permute.xlu0 %372 }
 0x109   : > { %v324_v12 = vpop.permute.xlu1 %323 }
 0x10a   : > { %344 = vst.msk [vmem:[#allocation3 + $0x20] sm:$0xff] %vm339_vm3, %v324_v12 }
 0x10b   : > { %393 = vst.msk [vmem:[#allocation3 + $0x20] sm:$0xff] %vm388_vm4, %v373_v11 }
 0x10e   : > { %468 = vrot.lane.b32.xlu0 %v1116_v47, %s992_s22  ;;  %661 = vrot.lane.b32.xlu2 %v497_v63, %s996_s26 }
 0x10f   : > { %612 = vrot.lane.b32.xlu1 %v448_v60, %s994_s24 }
 0x110   : > { %v570_v14 = vpop.permute.xlu2 %569  ;;  %v422_v15 = vpop.permute.xlu0 %421 }
 0x111   : > { %v463_v16 = vpop.permute.xlu1 %462  ;;  %442 = vst.msk [vmem:[#allocation3 + $0x20] sm:$0xff] %vm437_vm5, %v422_v15 }
 0x112   : > { %487 = vst.msk [vmem:[#allocation3] sm:$0xff] %vm486_vm6, %v463_v16 }
 0x116   : > { %427 = vrot.lane.b32.xlu0 %v551_v3, %s991_s21  ;;  %620 = vrot.lane.b32.xlu2 %v1179_v1, %s994_s24 }
 0x117   : > { %571 = vrot.lane.b32.xlu1 %v1139_v52, %s995_s25 }
 0x118   : > { %v426_v21 = vpop.permute.xlu2 %425  ;;  %v471_v22 = vpop.permute.xlu0 %470 }
 0x119   : > { %v512_v23 = vpop.permute.xlu1 %511  ;;  %491 = vst.msk [vmem:[#allocation3 + $0x20] sm:$0xff] %vm486_vm6, %v471_v22 }
 0x11a   : > { %536 = vst.msk [vmem:[#allocation3] sm:$0xff] %vm535_vm8, %v512_v23 }
 0x11e   : > { %476 = vrot.lane.b32.xlu0 %v1205_v5, %s992_s22  ;;  %669 = vrot.lane.b32.xlu2 %v1186_v2, %s996_s26 }
 0x11f   : > { %517 = vrot.lane.b32.xlu1 %v1114_v46, %s993_s23 }
 0x120   : > { %v367_v24 = vpop.permute.xlu2 %366  ;;  %v418_v25 = vpop.permute.xlu0 %417 }
 0x121   : > { %v562_v26 = vpop.permute.xlu1 %561  ;;  %440 = vst.msk [vmem:[#allocation3 + $0x10] sm:$0xff] %vm437_vm5, %v418_v25 }
 0x122   : > { %586 = vst.msk [vmem:[#allocation3] sm:$0xff] %vm585_vm9, %v562_v26 }
 0x123   : > { %635 = vst.msk [vmem:[#allocation3] sm:$0xff] %vm634_vm10, %v611_v10 }
 0x126   : > { %525 = vrot.lane.b32.xlu0 %v1220_v8, %s993_s23  ;;  %575 = vrot.lane.b32.xlu2 %v552_v27, %s995_s25 }
 0x127   : > { %567 = vrot.lane.b32.xlu1 %v1122_v48, %s995_s25 }
 0x128   : > { %v668_v28 = vpop.permute.xlu2 %667  ;;  %v377_v29 = vpop.permute.xlu0 %376 }
 0x129   : > { %v520_v30 = vpop.permute.xlu1 %519  ;;  %395 = vst.msk [vmem:[#allocation3 + $0x30] sm:$0xff] %vm388_vm4, %v377_v29 }
 0x12a   : > { %540 = vst.msk [vmem:[#allocation3 + $0x20] sm:$0xff] %vm535_vm8, %v520_v30 }
 0x12b   : > { %590 = vst.msk [vmem:[#allocation3 + $0x20] sm:$0xff] %vm585_vm9, %v570_v14 }
 0x12c   : > { %444 = vst.msk [vmem:[#allocation3 + $0x30] sm:$0xff] %vm437_vm5, %v426_v21 }
 0x12e   : > { %665 = vrot.lane.b32.xlu0 %v1162_v57, %s996_s26  ;;  %673 = vrot.lane.b32.xlu2 %v650_v31, %s996_s26 }
 0x12f   : > { %616 = vrot.lane.b32.xlu1 %v1146_v54, %s994_s24 }
 0x130   : > { %v524_v32 = vpop.permute.xlu2 %523  ;;  %v660_v33 = vpop.permute.xlu0 %659 }
 0x131   : > { %v467_v34 = vpop.permute.xlu1 %466  ;;  %684 = vst.msk [vmem:[#allocation3] sm:$0xff] %vm683_vm11, %v660_v33 }
 0x132   : > { %489 = vst.msk [vmem:[#allocation3 + $0x10] sm:$0xff] %vm486_vm6, %v467_v34 }
 0x137   : > { %624 = vrot.lane.b32.xlu1 %v601_v35, %s994_s24 }
 0x138   : > { %v465_v36 = vpop.permute.xlu2 %464  ;;  %v516_v37 = vpop.permute.xlu0 %515  ;;  %v692_v38 = vld [vmem:[#allocation3] sm:$0xff] }
 0x139   : > { %v318_v39 = vpop.permute.xlu1 %317  ;;  %538 = vst.msk [vmem:[#allocation3 + $0x10] sm:$0xff] %vm535_vm8, %v516_v37  ;;  %934 = vmatmul.msk.f32.vlgmr.msra.gmra.mxu0 %vm705_vm12, %v692_v38 }
 0x13a   : > { %341 = vst.msk [vmem:[#allocation3 + $0x8] sm:$0xff] %vm339_vm3, %v318_v39 }
 0x13b   : > { %390 = vst.msk [vmem:[#allocation3 + $0x8] sm:$0xff] %vm388_vm4, %v367_v24 }
 0x140   : > { %v322_v40 = vpop.permute.xlu2 %321  ;;  %v475_v41 = vpop.permute.xlu0 %474 }
 0x141   : > { %v619_v42 = vpop.permute.xlu1 %618  ;;  %343 = vst.msk [vmem:[#allocation3 + $0x18] sm:$0xff] %vm339_vm3, %v322_v40 }
 0x142   : > { %639 = vst.msk [vmem:[#allocation3 + $0x20] sm:$0xff] %vm634_vm10, %v619_v42 }
 0x143   : > { %688 = vst.msk [vmem:[#allocation3 + $0x20] sm:$0xff] %vm683_vm11, %v668_v28 }
 0x144   : > { %493 = vst.msk [vmem:[#allocation3 + $0x30] sm:$0xff] %vm486_vm6, %v475_v41 }
 0x145   : > { %542 = vst.msk [vmem:[#allocation3 + $0x30] sm:$0xff] %vm535_vm8, %v524_v32 }
 0x148   : > { %v326_v43 = vpop.permute.xlu0 %325  ;;  %v623_v46 = vpop.permute.xlu2 %622 }
 0x149   : > { %v566_v44 = vpop.permute.xlu1 %565  ;;  %345 = vst.msk [vmem:[#allocation3 + $0x28] sm:$0xff] %vm339_vm3, %v326_v43 }
 0x14a   : > { %588 = vst.msk [vmem:[#allocation3 + $0x10] sm:$0xff] %vm585_vm9, %v566_v44  ;;  %v696_v45 = vld [vmem:[#allocation3 + $0x20] sm:$0xff] }
 0x14b   : > { %938 = vmatmul.msk.f32.vlgmr.msra.gmra.mxu2 %vm705_vm12, %v696_v45 }
 0x150   : > { %v615_v47 = vpop.permute.xlu0 %614  ;;  %v564_v50 = vpop.permute.xlu2 %563 }
 0x151   : > { %v416_v48 = vpop.permute.xlu1 %415  ;;  %637 = vst.msk [vmem:[#allocation3 + $0x10] sm:$0xff] %vm634_vm10, %v615_v47 }
 0x152   : > { %439 = vst.msk [vmem:[#allocation3 + $0x8] sm:$0xff] %vm437_vm5, %v416_v48 }
 0x153   : > { %488 = vst.msk [vmem:[#allocation3 + $0x8] sm:$0xff] %vm486_vm6, %v465_v36 }
 0x158   : > { %v574_v49 = vpop.permute.xlu0 %573  ;;  %v420_v54 = vpop.permute.xlu2 %419 }
 0x159   : > { %v375_v51 = vpop.permute.xlu1 %374  ;;  %592 = vst.msk [vmem:[#allocation3 + $0x30] sm:$0xff] %vm585_vm9, %v574_v49 }
 0x15a   : > { %394 = vst.msk [vmem:[#allocation3 + $0x28] sm:$0xff] %vm388_vm4, %v375_v51 }
 0x15b   : > { %641 = vst.msk [vmem:[#allocation3 + $0x30] sm:$0xff] %vm634_vm10, %v623_v46 }
 0x160   : > { %v424_v52 = vpop.permute.xlu0 %423  ;;  %v379_v58 = vpop.permute.xlu2 %378 }
 0x161   : > { %v664_v53 = vpop.permute.xlu1 %663  ;;  %443 = vst.msk [vmem:[#allocation3 + $0x28] sm:$0xff] %vm437_vm5, %v424_v52 }
 0x162   : > { %686 = vst.msk [vmem:[#allocation3 + $0x10] sm:$0xff] %vm683_vm11, %v664_v53 }
 0x168   : > { %v371_v55 = vpop.permute.xlu0 %370  ;;  %v662_v61 = vpop.permute.xlu2 %661 }
 0x169   : > { %v514_v56 = vpop.permute.xlu1 %513  ;;  %392 = vst.msk [vmem:[#allocation3 + $0x18] sm:$0xff] %vm388_vm4, %v371_v55  ;;  %v694_v57 = vld [vmem:[#allocation3 + $0x10] sm:$0xff] }
 0x16a   : > { %537 = vst.msk [vmem:[#allocation3 + $0x8] sm:$0xff] %vm535_vm8, %v514_v56  ;;  %936 = vmatmul.msk.f32.vlgmr.msra.gmra.mxu1 %vm705_vm12, %v694_v57 }
 0x16b   : > { %587 = vst.msk [vmem:[#allocation3 + $0x8] sm:$0xff] %vm585_vm9, %v564_v50 }
 0x16c   : > { %441 = vst.msk [vmem:[#allocation3 + $0x18] sm:$0xff] %vm437_vm5, %v420_v54 }
 0x170   : > { %v672_v59 = vpop.permute.xlu0 %671  ;;  %v621_v2 = vpop.permute.xlu2 %620 }
 0x171   : > { %v473_v60 = vpop.permute.xlu1 %472  ;;  %690 = vst.msk [vmem:[#allocation3 + $0x30] sm:$0xff] %vm683_vm11, %v672_v59 }
 0x172   : > { %492 = vst.msk [vmem:[#allocation3 + $0x28] sm:$0xff] %vm486_vm6, %v473_v60 }
 0x178   : > { %v522_v62 = vpop.permute.xlu0 %521  ;;  %v698_v63 = vld [vmem:[#allocation3 + $0x30] sm:$0xff]  ;;  %v670_v7 = vpop.permute.xlu2 %669 }
 0x179   : > { %v330_v0 = vpop.permute.xlu1 %329  ;;  %541 = vst.msk [vmem:[#allocation3 + $0x28] sm:$0xff] %vm535_vm8, %v522_v62  ;;  %940 = vmatmul.msk.f32.vlgmr.msra.gmra.mxu3 %vm705_vm12, %v698_v63 }
 0x17a   : > { %347 = vst.msk [vmem:[#allocation3 + $0x38] sm:$0xff] %vm339_vm3, %v330_v0 }
 0x17b   : > { %396 = vst.msk [vmem:[#allocation3 + $0x38] sm:$0xff] %vm388_vm4, %v379_v58 }
 0x180   : > { %v469_v1 = vpop.permute.xlu0 %468  ;;  %v576_v12 = vpop.permute.xlu2 %575 }
 0x181   : > { %v613_v3 = vpop.permute.xlu1 %612  ;;  %490 = vst.msk [vmem:[#allocation3 + $0x18] sm:$0xff] %vm486_vm6, %v469_v1 }
 0x182   : > { %636 = vst.msk [vmem:[#allocation3 + $0x8] sm:$0xff] %vm634_vm10, %v613_v3 }
 0x183   : > { %685 = vst.msk [vmem:[#allocation3 + $0x8] sm:$0xff] %vm683_vm11, %v662_v61 }
 0x188   : > { %v428_v4 = vpop.permute.xlu0 %427  ;;  %v674_v16 = vpop.permute.xlu2 %673 }
 0x189   : > { %v572_v5 = vpop.permute.xlu1 %571  ;;  %445 = vst.msk [vmem:[#allocation3 + $0x38] sm:$0xff] %vm437_vm5, %v428_v4 }
 0x18a   : > { %591 = vst.msk [vmem:[#allocation3 + $0x28] sm:$0xff] %vm585_vm9, %v572_v5  ;;  %v693_v6 = vld [vmem:[#allocation3 + $0x8] sm:$0xff] }
 0x18b   : > { %640 = vst.msk [vmem:[#allocation3 + $0x28] sm:$0xff] %vm634_vm10, %v621_v2  ;;  %935 = vmatmul.msk.f32.gmra.mxu0 %vm705_vm12, %v693_v6 }
 0x18c   : > { %689 = vst.msk [vmem:[#allocation3 + $0x28] sm:$0xff] %vm683_vm11, %v670_v7 }
 0x190   : > { %v477_v8 = vpop.permute.xlu0 %476 }
 0x191   : > { %v518_v9 = vpop.permute.xlu1 %517  ;;  %494 = vst.msk [vmem:[#allocation3 + $0x38] sm:$0xff] %vm486_vm6, %v477_v8 }
 0x192   : > { %539 = vst.msk [vmem:[#allocation3 + $0x18] sm:$0xff] %vm535_vm8, %v518_v9 }
 0x193   : > { %v697_v10 = vld [vmem:[#allocation3 + $0x28] sm:$0xff] }
 0x194   : > { %939 = vmatmul.msk.f32.gmra.mxu2 %vm705_vm12, %v697_v10 }
 0x198   : > { %v526_v11 = vpop.permute.xlu0 %525 }
 0x199   : > { %v568_v13 = vpop.permute.xlu1 %567  ;;  %543 = vst.msk [vmem:[#allocation3 + $0x38] sm:$0xff] %vm535_vm8, %v526_v11 }
 0x19a   : > { %589 = vst.msk [vmem:[#allocation3 + $0x18] sm:$0xff] %vm585_vm9, %v568_v13 }
 0x19b   : > { %593 = vst.msk [vmem:[#allocation3 + $0x38] sm:$0xff] %vm585_vm9, %v576_v12 }
 0x1a0   : > { %v666_v14 = vpop.permute.xlu0 %665 }
 0x1a1   : > { %v617_v15 = vpop.permute.xlu1 %616 }
 0x1a2   : > { %638 = vst.msk [vmem:[#allocation3 + $0x18] sm:$0xff] %vm634_vm10, %v617_v15 }
 0x1a3   : > { %687 = vst.msk [vmem:[#allocation3 + $0x18] sm:$0xff] %vm683_vm11, %v666_v14 }
 0x1a9   : > { %v625_v17 = vpop.permute.xlu1 %624 }
 0x1aa   : > { %642 = vst.msk [vmem:[#allocation3 + $0x38] sm:$0xff] %vm634_vm10, %v625_v17  ;;  %v695_v18 = vld [vmem:[#allocation3 + $0x18] sm:$0xff] }
 0x1ab   : > { %691 = vst.msk [vmem:[#allocation3 + $0x38] sm:$0xff] %vm683_vm11, %v674_v16  ;;  %937 = vmatmul.msk.f32.gmra.mxu1 %vm705_vm12, %v695_v18 }
 0x1b2   : > { %v699_v19 = vld [vmem:[#allocation3 + $0x38] sm:$0xff] }
 0x1b3   : > { %941 = vmatmul.msk.f32.gmra.mxu3 %vm705_vm12, %v699_v19 }
 0x1b6   : > { %v751_v20 = vpop.f32.mrf.mxu0 }
 0x1b7   : > { %776 = vst.msk [vmem:[%s1345_s15] sm:$0xff] %vm775_vm13, %v751_v20  ;;  %v807_v27 = vmul.f32 %v751_v20, %v751_v20  ;;  %v784_v29 = vsel %vm775_vm13, %v751_v20, 0.0 }
 0x1b9   : > { %v815_v32 = vsel %vm775_vm13, %v807_v27, 0.0 }
 0x1ce   : > { %v763_v21 = vpop.f32.mrf.mxu2 }
 0x1cf   : > { %780 = vst.msk [vmem:[%s1345_s15 + $0x20] sm:$0xff] %vm775_vm13, %v763_v21  ;;  %v811_v43 = vmul.f32 %v763_v21, %v763_v21  ;;  %v791_v46 = vsel %vm775_vm13, %v763_v21, 0.0 }
 0x1d1   : > { %v822_v48 = vsel %vm775_vm13, %v811_v43, 0.0 }
 0x1e7   : > { %v757_v22 = vpop.f32.mrf.mxu1 }
 0x1e8   : > { %778 = vst.msk [vmem:[%s1345_s15 + $0x10] sm:$0xff] %vm775_vm13, %v757_v22  ;;  %v809_v33 = vmul.f32 %v757_v22, %v757_v22  ;;  %v787_v35 = vsel %vm775_vm13, %v757_v22, 0.0 }
 0x1ea   : > { %v818_v38 = vsel %vm775_vm13, %v809_v33, 0.0 }
 0x1fc   : > { %v769_v23 = vpop.f32.mrf.mxu3 }
 0x1fd   : > { %782 = vst.msk [vmem:[%s1345_s15 + $0x30] sm:$0xff] %vm775_vm13, %v769_v23  ;;  %v813_v53 = vmul.f32 %v769_v23, %v769_v23  ;;  %v795_v56 = vsel %vm775_vm13, %v769_v23, 0.0 }
 0x1ff   : > { %v826_v59 = vsel %vm775_vm13, %v813_v53, 0.0 }
 0x208   : > { %v754_v24 = vpop.f32.mrf.mxu0 }
 0x209   : > { %777 = vst.msk [vmem:[%s1345_s15 + $0x8] sm:$0xff] %vm775_vm13, %v754_v24  ;;  %v808_v26 = vmul.f32 %v754_v24, %v754_v24  ;;  %v785_v28 = vsel %vm775_vm13, %v754_v24, 0.0 }
 0x20a   : > { %v786_v31 = vadd.f32 %v785_v28, %v784_v29 }
 0x20b   : > { %v816_v30 = vsel %vm775_vm13, %v808_v26, 0.0 }
 0x20c   : > { %v817_v34 = vadd.f32 %v816_v30, %v815_v32  ;;  %v788_v37 = vadd.f32 %v787_v35, %v786_v31 }
 0x20e   : > { %v819_v42 = vadd.f32 %v818_v38, %v817_v34 }
 0x217   : > { %v766_v25 = vpop.f32.mrf.mxu2 }
 0x218   : > { %781 = vst.msk [vmem:[%s1345_s15 + $0x28] sm:$0xff] %vm775_vm13, %v766_v25  ;;  %v812_v49 = vmul.f32 %v766_v25, %v766_v25  ;;  %v793_v51 = vsel %vm775_vm13, %v766_v25, 0.0 }
 0x21a   : > { %v824_v54 = vsel %vm775_vm13, %v812_v49, 0.0 }
 0x228   : > { %v760_v36 = vpop.f32.mrf.mxu1 }
 0x229   : > { %779 = vst.msk [vmem:[%s1345_s15 + $0x18] sm:$0xff] %vm775_vm13, %v760_v36  ;;  %v789_v39 = vsel %vm775_vm13, %v760_v36, 0.0  ;;  %v810_v40 = vmul.f32 %v760_v36, %v760_v36 }
 0x22a   : > { %v790_v41 = vadd.f32 %v789_v39, %v788_v37 }
 0x22b   : > { %v820_v44 = vsel %vm775_vm13, %v810_v40, 0.0 }
 0x22c   : > { %v821_v45 = vadd.f32 %v820_v44, %v819_v42  ;;  %v792_v47 = vadd.f32 %v791_v46, %v790_v41 }
 0x22e   : > { %v823_v50 = vadd.f32 %v822_v48, %v821_v45  ;;  %v794_v52 = vadd.f32 %v793_v51, %v792_v47 }
 0x230   : > { %v825_v55 = vadd.f32 %v824_v54, %v823_v50  ;;  %v796_v58 = vadd.f32 %v795_v56, %v794_v52 }
 0x232   : > { %v827_v63 = vadd.f32 %v826_v59, %v825_v55 }
 0x236   : > { %v772_v57 = vpop.f32.mrf.mxu3 }
 0x237   : > { %783 = vst.msk [vmem:[%s1345_s15 + $0x38] sm:$0xff] %vm775_vm13, %v772_v57  ;;  %v797_v60 = vsel %vm775_vm13, %v772_v57, 0.0  ;;  %v814_v61 = vmul.f32 %v772_v57, %v772_v57 }
 0x238   : > { %v798_v62 = vadd.f32 %v797_v60, %v796_v58 }
 0x239   : > { %v828_v0 = vsel %vm775_vm13, %v814_v61, 0.0 }
 0x23a   : > { %v799_v1 = vrot.slane %v798_v62, 4  ;;  %v829_v2 = vadd.f32 %v828_v0, %v827_v63 }
 0x23c   : > { %v800_v3 = vadd.f32 %v799_v1, %v798_v62  ;;  %v830_v4 = vrot.slane %v829_v2, 4 }
 0x23e   : > { %v801_v5 = vrot.slane %v800_v3, 2  ;;  %v831_v6 = vadd.f32 %v830_v4, %v829_v2 }
 0x240   : > { %v802_v7 = vadd.f32 %v801_v5, %v800_v3  ;;  %v832_v8 = vrot.slane %v831_v6, 2 }
 0x242   : > { %v803_v9 = vrot.slane %v802_v7, 1  ;;  %v833_v10 = vadd.f32 %v832_v8, %v831_v6 }
 0x244   : > { %v804_v11 = vadd.f32 %v803_v9, %v802_v7  ;;  %v834_v12 = vrot.slane %v833_v10, 1 }
 0x246   : > { %806 = vst.msk [vmem:[%s181_s19] sm:$0x1] %vm805_vm14, %v804_v11  ;;  %v835_v13 = vadd.f32 %v834_v12, %v833_v10 }
 0x248   : > { %836 = vst.msk [vmem:[%s181_s19 + $0x1] sm:$0x1] %vm805_vm14, %v835_v13 }
 0x249 PF: > { %s14_s12 = sadd.s32 1, %s985_s12  }
 0x24a   : > { %p11_p4 = scmp.ge.s32.totalorder %s14_s12, 4  }
 0x24c   :  { %13 = sbr.rel (!%p11_p4) target bundleno = 1 (0x1), region = 73 }

</bundles_post_ra>
